<compile_context>
chip_gen: v7x
topology: tpu7x:2x2x1
jax: 0.10.0
libtpu: 0.0.40
codegen_flags: <defaults>
</compile_context>

<pallas_src>
import functools
import math

import jax
import jax.numpy as jnp
from jax import lax
from jax.experimental import pallas as pl
from jax.experimental.pallas import tpu as pltpu


def _decoder_layer_kernel(scal_ref, x_ref, kv_ref,
                          wq_ref, wk_ref, wv_ref, wo_ref, w1_ref, w2_ref,
                          bq_ref, bk_ref, bv_ref, bo_ref, b1_ref, b2_ref,
                          g_ref, be_ref, o_ref, *, num_heads, eps, l_tile):
    f32 = jnp.float32
    b_blk, L, D = x_ref.shape
    dh = D // num_heads
    dt = x_ref.dtype

    gamma = g_ref[...].astype(f32)        # (1, D)
    beta = be_ref[...].astype(f32)        # (1, D)
    r = scal_ref[0].astype(f32)           # self.rand
    rz = scal_ref[1].astype(f32)          # self.rand_z

    def layer_norm(t):  # torch.nn.LayerNorm: biased variance, eps inside rsqrt
        mu = jnp.mean(t, axis=-1, keepdims=True)
        d = t - mu
        var = jnp.mean(d * d, axis=-1, keepdims=True)
        return d * lax.rsqrt(var + eps) * gamma + beta

    # Whole weight matrices stay resident in VMEM (single-buffered); load once.
    wq = wq_ref[...]                       # (D, D), 1/sqrt(dh) pre-folded
    wk = wk_ref[...]
    wv = wv_ref[...]
    wo = wo_ref[...]
    w1 = w1_ref[...]                       # (D, 2D)
    w2 = w2_ref[...]                       # (2D, D)
    bq = bq_ref[...].astype(f32)           # (1, D), pre-scaled
    bk = bk_ref[...].astype(f32)
    bv = bv_ref[...].astype(f32)
    bo = bo_ref[...].astype(f32)
    b1 = b1_ref[...].astype(f32)
    b2 = b2_ref[...].astype(f32)

    for bi in range(b_blk):                # static unroll over folded batch elems
        x_b = x_ref[bi]                    # (L, D) native dtype
        kv_b = kv_ref[bi]                  # (S, D) native dtype

        # K/V projections once per batch element; reused by every L tile.
        k = jnp.dot(kv_b, wk, preferred_element_type=f32) + bk        # (S, D) f32
        v = jnp.dot(kv_b, wv, preferred_element_type=f32) + bv        # (S, D) f32

        for lo in range(0, L, l_tile):     # static L tiling (bounds live temps)
            hi = min(L, lo + l_tile)
            xt = x_b[lo:hi]                # (TL, D) native dtype

            # Q projection; softmax scale already folded into wq/bq on the host.
            q = jnp.dot(xt, wq, preferred_element_type=f32) + bq      # (TL, D) f32

            # Per-head attention: accumulate straight into the output projection;
            # no lane-axis concat of dh-wide context pieces.
            acc = None
            for h in range(num_heads):     # static unroll; num_heads small
                hs, he = h * dh, (h + 1) * dh
                s = lax.dot_general(q[:, hs:he], k[:, hs:he],
                                    (((1,), (1,)), ((), ())),
                                    preferred_element_type=f32)        # (TL, S)
                s = s - jnp.max(s, axis=-1, keepdims=True)
                e = jnp.exp(s)
                inv = pl.reciprocal(jnp.sum(e, axis=-1, keepdims=True), approx=True)
                p = e * inv
                ctx = jnp.dot(p, v[:, hs:he], preferred_element_type=f32)  # (TL, dh)
                part = jnp.dot(ctx.astype(dt), wo[hs:he, :],
                               preferred_element_type=f32)              # (TL, D)
                acc = part if acc is None else acc + part
            att = acc + bo                                              # (TL, D) f32

            # gated residual 1 + shared LayerNorm
            x1 = layer_norm(r * xt.astype(f32) + (1.0 - r) * att)

            # FFN: D -> 2D -> D with ReLU
            h1 = jnp.dot(x1.astype(dt), w1, preferred_element_type=f32) + b1
            h2 = jnp.dot(jnp.maximum(h1, 0.0).astype(dt), w2,
                         preferred_element_type=f32) + b2

            # gated residual 2 + shared LayerNorm; single downcast at the store
            out = layer_norm(rz * x1 + (1.0 - rz) * h2)
            o_ref[bi, lo:hi, :] = out.astype(o_ref.dtype)


def _pick_batch_block(N, L, S, D, max_unroll=8):
    """Fold batch elems into one grid step while per-step f32 temps stay tiny."""
    per_elem_bytes = 4 * (8 * L * D + 3 * S * D + L * S)
    for cand in range(min(N, max_unroll), 0, -1):
        if N % cand == 0 and cand * per_elem_bytes <= (2 << 20):
            return cand
    return 1


def decoder_layer(x, attention_mask, clip_his, params, *, num_heads, eps=1e-12,
                  l_tile=256):
    """x: (N, L, D); clip_his: (N, S, D); params hold torch-style (out, in) weights."""
    del attention_mask  # reference forward never forwards it to self.attention
    N, L, D = x.shape
    Nc, S, Dc = clip_his.shape
    assert N == Nc and D == Dc and D % num_heads == 0
    dh = D // num_heads

    f32 = jnp.float32
    scalars = jnp.stack([jnp.asarray(params["rand"], f32).reshape(()),
                         jnp.asarray(params["rand_z"], f32).reshape(())])  # (2,)

    def t(w):   # torch nn.Linear weight (out, in) -> (in, out) so kernel does x @ wT + b
        return jnp.asarray(w).T

    def row(b):
        return jnp.asarray(b).reshape(1, -1)

    scale = 1.0 / math.sqrt(dh)
    wqT = t(params["wq"]) * jnp.asarray(scale, params["wq"].dtype)   # fold softmax scale
    bq = row(params["bq"]) * scale
    wkT, wvT, woT = t(params["wk"]), t(params["wv"]), t(params["wo"])
    w1T, w2T = t(params["w1"]), t(params["w2"])
    bk, bv, bo = row(params["bk"]), row(params["bv"]), row(params["bo"])
    b1, b2 = row(params["b1"]), row(params["b2"])
    gamma, beta = row(params["gamma"]), row(params["beta"])

    b_blk = _pick_batch_block(N, L, S, D)
    l_tile = max(8, min(l_tile, L))

    kernel = functools.partial(_decoder_layer_kernel, num_heads=num_heads, eps=eps,
                               l_tile=l_tile)

    # Constant weights: whole array resident in VMEM, single-buffered (index does
    # not change across the grid, so pipelined double-buffering would only double
    # the resident footprint -- matters on v7x's 64 MiB VMEM).
    resident = pl.BlockSpec(memory_space=pltpu.MemorySpace.VMEM)
    smem = pl.BlockSpec(memory_space=pltpu.MemorySpace.SMEM)

    try:
        vmem_limit = int(min(pltpu.get_tpu_info().vmem_capacity_bytes // 2, 64 << 20))
    except Exception:  # pragma: no cover - conservative fallback
        vmem_limit = 32 << 20

    out = pl.pallas_call(
        kernel,
        out_shape=jax.ShapeDtypeStruct((N, L, D), x.dtype),
        grid_spec=pltpu.PrefetchScalarGridSpec(
            num_scalar_prefetch=0,
            grid=(N // b_blk,),
            in_specs=[
                smem,                                                  # rand, rand_z
                pl.BlockSpec((b_blk, L, D), lambda b: (b, 0, 0)),      # x
                pl.BlockSpec((b_blk, S, D), lambda b: (b, 0, 0)),      # clip_his
                resident, resident, resident, resident,                # WqT..WoT
                resident, resident,                                    # W1T, W2T
                resident, resident, resident, resident,                # bq..bo
                resident, resident,                                    # b1, b2
                resident, resident,                                    # gamma, beta
            ],
            out_specs=pl.BlockSpec((b_blk, L, D), lambda b: (b, 0, 0)),
        ),
        compiler_params=pltpu.CompilerParams(
            dimension_semantics=("parallel",),
            vmem_limit_bytes=vmem_limit,
        ),
    )(scalars, x, clip_his, wqT, wkT, wvT, woT, w1T, w2T,
      bq, bk, bv, bo, b1, b2, gamma, beta)
    return out


def _reference(x, clip_his, params, *, num_heads, eps):
    N, L, D = x.shape
    dh = D // num_heads
    hp = jax.lax.Precision.HIGHEST

    def linear(t, w, b):
        return jnp.einsum("...d,od->...o", t, w, precision=hp) + b

    q = linear(x, params["wq"], params["bq"]).reshape(N, L, num_heads, dh)
    k = linear(clip_his, params["wk"], params["bk"]).reshape(N, -1, num_heads, dh)
    v = linear(clip_his, params["wv"], params["bv"]).reshape(N, -1, num_heads, dh)
    s = jnp.einsum("blhd,bshd->bhls", q, k, precision=hp) / math.sqrt(dh)
    p = jax.nn.softmax(s, axis=-1)
    ctx = jnp.einsum("bhls,bshd->blhd", p, v, precision=hp).reshape(N, L, D)
    att = linear(ctx, params["wo"], params["bo"])

    def layer_norm(t):
        mu = jnp.mean(t, axis=-1, keepdims=True)
        var = jnp.mean((t - mu) ** 2, axis=-1, keepdims=True)
        return (t - mu) / jnp.sqrt(var + eps) * params["gamma"] + params["beta"]

    x1 = layer_norm(params["rand"] * x + (1.0 - params["rand"]) * att)
    f = linear(jnp.maximum(linear(x1, params["w1"], params["b1"]), 0.0),
               params["w2"], params["b2"])
    return layer_norm(params["rand_z"] * x1 + (1.0 - params["rand_z"]) * f)


if __name__ == "__main__":
    N, L, S, D, H = 2, 8, 16, 32, 4        # batch, tgt seq, clip-history seq, hidden, heads
    eps = 1e-12

    key = jax.random.PRNGKey(0)
    ks = jax.random.split(key, 18)

    x = jax.random.normal(ks[0], (N, L, D), dtype=jnp.float32)
    clip_his = jax.random.normal(ks[1], (N, S, D), dtype=jnp.float32)
    attention_mask = jnp.ones((N, S), dtype=jnp.float32)   # mirrors torch API; unused

    def w(k, o, i):   # torch nn.Linear weight layout: (out_features, in_features)
        return 0.05 * jax.random.normal(k, (o, i), dtype=jnp.float32)

    params = dict(
        wq=w(ks[2], D, D), bq=0.01 * jax.random.normal(ks[3], (D,), jnp.float32),
        wk=w(ks[4], D, D), bk=0.01 * jax.random.normal(ks[5], (D,), jnp.float32),
        wv=w(ks[6], D, D), bv=0.01 * jax.random.normal(ks[7], (D,), jnp.float32),
        wo=w(ks[8], D, D), bo=0.01 * jax.random.normal(ks[9], (D,), jnp.float32),
        w1=w(ks[10], 2 * D, D), b1=0.01 * jax.random.normal(ks[11], (2 * D,), jnp.float32),
        w2=w(ks[12], D, 2 * D), b2=0.01 * jax.random.normal(ks[13], (D,), jnp.float32),
        gamma=1.0 + 0.1 * jax.random.normal(ks[14], (D,), jnp.float32),
        beta=0.1 * jax.random.normal(ks[15], (D,), jnp.float32),
        rand=jax.random.normal(ks[16], (), jnp.float32),
        rand_z=jax.random.normal(ks[17], (), jnp.float32),
    )

    out = decoder_layer(x, attention_mask, clip_his, params, num_heads=H, eps=eps)
    out = jax.block_until_ready(out)

    ref = _reference(x, clip_his, params, num_heads=H, eps=eps)
    assert out.shape == (N, L, D)
    assert jnp.allclose(out, ref, atol=2e-3, rtol=2e-3), (
        f"mismatch vs reference, max abs err {jnp.max(jnp.abs(out - ref))}")

    print("KERNEL_OK")
</pallas_src>

<mosaic_0001>
module attributes {stable_mosaic.version = 11 : i64} {
  func.func @_decoder_layer_kernel(%arg0: i32, %arg1: memref<2xf32, #tpu.memory_space<smem>>, %arg2: memref<2x8x32xf32, #tpu.memory_space<vmem>>, %arg3: memref<2x16x32xf32, #tpu.memory_space<vmem>>, %arg4: memref<32x32xf32, #tpu.memory_space<vmem>>, %arg5: memref<32x32xf32, #tpu.memory_space<vmem>>, %arg6: memref<32x32xf32, #tpu.memory_space<vmem>>, %arg7: memref<32x32xf32, #tpu.memory_space<vmem>>, %arg8: memref<32x64xf32, #tpu.memory_space<vmem>>, %arg9: memref<64x32xf32, #tpu.memory_space<vmem>>, %arg10: memref<1x32xf32, #tpu.memory_space<vmem>>, %arg11: memref<1x32xf32, #tpu.memory_space<vmem>>, %arg12: memref<1x32xf32, #tpu.memory_space<vmem>>, %arg13: memref<1x32xf32, #tpu.memory_space<vmem>>, %arg14: memref<1x64xf32, #tpu.memory_space<vmem>>, %arg15: memref<1x32xf32, #tpu.memory_space<vmem>>, %arg16: memref<1x32xf32, #tpu.memory_space<vmem>>, %arg17: memref<1x32xf32, #tpu.memory_space<vmem>>, %arg18: memref<2x8x32xf32, #tpu.memory_space<vmem>>) attributes {dimension_semantics = [#tpu.dimension_semantics<parallel>], iteration_bounds = array<i64: 1>, scalar_prefetch = 0 : i64, scratch_operands = 0 : i64, tpu.core_type = #tpu.core_type<tc>, window_params = [{transform_indices = @transform_0, window_bounds = array<i64: 2>}, {transform_indices = @transform_1, window_bounds = array<i64: 2, 8, 32>}, {transform_indices = @transform_2, window_bounds = array<i64: 2, 16, 32>}, {pipeline_mode = #tpu.pipeline_mode<synchronous>, transform_indices = @transform_3, window_bounds = array<i64: 32, 32>}, {pipeline_mode = #tpu.pipeline_mode<synchronous>, transform_indices = @transform_4, window_bounds = array<i64: 32, 32>}, {pipeline_mode = #tpu.pipeline_mode<synchronous>, transform_indices = @transform_5, window_bounds = array<i64: 32, 32>}, {pipeline_mode = #tpu.pipeline_mode<synchronous>, transform_indices = @transform_6, window_bounds = array<i64: 32, 32>}, {pipeline_mode = #tpu.pipeline_mode<synchronous>, transform_indices = @transform_7, window_bounds = array<i64: 32, 64>}, {pipeline_mode = #tpu.pipeline_mode<synchronous>, transform_indices = @transform_8, window_bounds = array<i64: 64, 32>}, {pipeline_mode = #tpu.pipeline_mode<synchronous>, transform_indices = @transform_9, window_bounds = array<i64: 1, 32>}, {pipeline_mode = #tpu.pipeline_mode<synchronous>, transform_indices = @transform_10, window_bounds = array<i64: 1, 32>}, {pipeline_mode = #tpu.pipeline_mode<synchronous>, transform_indices = @transform_11, window_bounds = array<i64: 1, 32>}, {pipeline_mode = #tpu.pipeline_mode<synchronous>, transform_indices = @transform_12, window_bounds = array<i64: 1, 32>}, {pipeline_mode = #tpu.pipeline_mode<synchronous>, transform_indices = @transform_13, window_bounds = array<i64: 1, 64>}, {pipeline_mode = #tpu.pipeline_mode<synchronous>, transform_indices = @transform_14, window_bounds = array<i64: 1, 32>}, {pipeline_mode = #tpu.pipeline_mode<synchronous>, transform_indices = @transform_15, window_bounds = array<i64: 1, 32>}, {pipeline_mode = #tpu.pipeline_mode<synchronous>, transform_indices = @transform_16, window_bounds = array<i64: 1, 32>}, {transform_indices = @transform_17, window_bounds = array<i64: 2, 8, 32>}]} {
    %c0 = arith.constant 0 : index
    %c0_0 = arith.constant 0 : index
    %0 = vector.load %arg16[%c0, %c0_0] : memref<1x32xf32, #tpu.memory_space<vmem>>, vector<1x32xf32>
    %c0_1 = arith.constant 0 : index
    %c0_2 = arith.constant 0 : index
    %1 = vector.load %arg17[%c0_1, %c0_2] : memref<1x32xf32, #tpu.memory_space<vmem>>, vector<1x32xf32>
    %c0_3 = arith.constant 0 : index
    %2 = memref.load %arg1[%c0_3] : memref<2xf32, #tpu.memory_space<smem>>
    %c1 = arith.constant 1 : index
    %3 = memref.load %arg1[%c1] : memref<2xf32, #tpu.memory_space<smem>>
    %c0_4 = arith.constant 0 : index
    %c0_5 = arith.constant 0 : index
    %4 = vector.load %arg4[%c0_4, %c0_5] : memref<32x32xf32, #tpu.memory_space<vmem>>, vector<32x32xf32>
    %c0_6 = arith.constant 0 : index
    %c0_7 = arith.constant 0 : index
    %5 = vector.load %arg5[%c0_6, %c0_7] : memref<32x32xf32, #tpu.memory_space<vmem>>, vector<32x32xf32>
    %c0_8 = arith.constant 0 : index
    %c0_9 = arith.constant 0 : index
    %6 = vector.load %arg6[%c0_8, %c0_9] : memref<32x32xf32, #tpu.memory_space<vmem>>, vector<32x32xf32>
    %c0_10 = arith.constant 0 : index
    %c0_11 = arith.constant 0 : index
    %7 = vector.load %arg7[%c0_10, %c0_11] : memref<32x32xf32, #tpu.memory_space<vmem>>, vector<32x32xf32>
    %c0_12 = arith.constant 0 : index
    %c0_13 = arith.constant 0 : index
    %8 = vector.load %arg8[%c0_12, %c0_13] : memref<32x64xf32, #tpu.memory_space<vmem>>, vector<32x64xf32>
    %c0_14 = arith.constant 0 : index
    %c0_15 = arith.constant 0 : index
    %9 = vector.load %arg9[%c0_14, %c0_15] : memref<64x32xf32, #tpu.memory_space<vmem>>, vector<64x32xf32>
    %c0_16 = arith.constant 0 : index
    %c0_17 = arith.constant 0 : index
    %10 = vector.load %arg10[%c0_16, %c0_17] : memref<1x32xf32, #tpu.memory_space<vmem>>, vector<1x32xf32>
    %c0_18 = arith.constant 0 : index
    %c0_19 = arith.constant 0 : index
    %11 = vector.load %arg11[%c0_18, %c0_19] : memref<1x32xf32, #tpu.memory_space<vmem>>, vector<1x32xf32>
    %c0_20 = arith.constant 0 : index
    %c0_21 = arith.constant 0 : index
    %12 = vector.load %arg12[%c0_20, %c0_21] : memref<1x32xf32, #tpu.memory_space<vmem>>, vector<1x32xf32>
    %c0_22 = arith.constant 0 : index
    %c0_23 = arith.constant 0 : index
    %13 = vector.load %arg13[%c0_22, %c0_23] : memref<1x32xf32, #tpu.memory_space<vmem>>, vector<1x32xf32>
    %c0_24 = arith.constant 0 : index
    %c0_25 = arith.constant 0 : index
    %14 = vector.load %arg14[%c0_24, %c0_25] : memref<1x64xf32, #tpu.memory_space<vmem>>, vector<1x64xf32>
    %c0_26 = arith.constant 0 : index
    %c0_27 = arith.constant 0 : index
    %15 = vector.load %arg15[%c0_26, %c0_27] : memref<1x32xf32, #tpu.memory_space<vmem>>, vector<1x32xf32>
    %c0_28 = arith.constant 0 : index
    %c0_29 = arith.constant 0 : index
    %c0_30 = arith.constant 0 : index
    %16 = vector.load %arg2[%c0_28, %c0_29, %c0_30] : memref<2x8x32xf32, #tpu.memory_space<vmem>>, vector<1x8x32xf32>
    %17 = vector.shape_cast %16 : vector<1x8x32xf32> to vector<8x32xf32>
    %c0_31 = arith.constant 0 : index
    %c0_32 = arith.constant 0 : index
    %c0_33 = arith.constant 0 : index
    %18 = vector.load %arg3[%c0_31, %c0_32, %c0_33] : memref<2x16x32xf32, #tpu.memory_space<vmem>>, vector<1x16x32xf32>
    %19 = vector.shape_cast %18 : vector<1x16x32xf32> to vector<16x32xf32>
    %cst = arith.constant dense<0.000000e+00> : vector<16x32xf32>
    %20 = tpu.matmul %19, %5, %cst {dimension_numbers = #tpu.dot_dimension_numbers<[1], [0], [0], [1], [0, 0, 1, 1], [], []>} : vector<16x32xf32>, vector<32x32xf32>, vector<16x32xf32> -> vector<16x32xf32>
    %21 = vector.broadcast %11 : vector<1x32xf32> to vector<16x32xf32>
    %22 = arith.addf %20, %21 : vector<16x32xf32>
    %cst_34 = arith.constant dense<0.000000e+00> : vector<16x32xf32>
    %23 = tpu.matmul %19, %6, %cst_34 {dimension_numbers = #tpu.dot_dimension_numbers<[1], [0], [0], [1], [0, 0, 1, 1], [], []>} : vector<16x32xf32>, vector<32x32xf32>, vector<16x32xf32> -> vector<16x32xf32>
    %24 = vector.broadcast %12 : vector<1x32xf32> to vector<16x32xf32>
    %25 = arith.addf %23, %24 : vector<16x32xf32>
    %cst_35 = arith.constant dense<0.000000e+00> : vector<8x32xf32>
    %26 = tpu.matmul %17, %4, %cst_35 {dimension_numbers = #tpu.dot_dimension_numbers<[1], [0], [0], [1], [0, 0, 1, 1], [], []>} : vector<8x32xf32>, vector<32x32xf32>, vector<8x32xf32> -> vector<8x32xf32>
    %27 = vector.broadcast %10 : vector<1x32xf32> to vector<8x32xf32>
    %28 = arith.addf %26, %27 : vector<8x32xf32>
    %29 = vector.extract_strided_slice %28 {offsets = [0, 0], sizes = [8, 8], strides = [1, 1]} : vector<8x32xf32> to vector<8x8xf32>
    %30 = vector.extract_strided_slice %22 {offsets = [0, 0], sizes = [16, 8], strides = [1, 1]} : vector<16x32xf32> to vector<16x8xf32>
    %cst_36 = arith.constant dense<0.000000e+00> : vector<8x16xf32>
    %31 = tpu.matmul %29, %30, %cst_36 {dimension_numbers = #tpu.dot_dimension_numbers<[1], [1], [0], [0], [0, 0, 1, 0], [], []>} : vector<8x8xf32>, vector<16x8xf32>, vector<8x16xf32> -> vector<8x16xf32>
    %cst_37 = arith.constant dense<0xFF800000> : vector<8xf32>
    %32 = vector.multi_reduction <maximumf>, %31, %cst_37 [1] : vector<8x16xf32> to vector<8xf32>
    %33 = vector.shape_cast %32 : vector<8xf32> to vector<8x1xf32>
    %34 = vector.broadcast %33 : vector<8x1xf32> to vector<8x16xf32>
    %35 = arith.subf %31, %34 : vector<8x16xf32>
    %36 = math.exp %35 : vector<8x16xf32>
    %cst_38 = arith.constant dense<0.000000e+00> : vector<8xf32>
    %37 = vector.multi_reduction <add>, %36, %cst_38 [1] : vector<8x16xf32> to vector<8xf32>
    %38 = vector.shape_cast %37 : vector<8xf32> to vector<8x1xf32>
    %39 = tpu.reciprocal %38 {approx = true} : vector<8x1xf32> -> vector<8x1xf32>
    %40 = vector.broadcast %39 : vector<8x1xf32> to vector<8x16xf32>
    %41 = arith.mulf %36, %40 : vector<8x16xf32>
    %42 = vector.extract_strided_slice %25 {offsets = [0, 0], sizes = [16, 8], strides = [1, 1]} : vector<16x32xf32> to vector<16x8xf32>
    %cst_39 = arith.constant dense<0.000000e+00> : vector<8x8xf32>
    %43 = tpu.matmul %41, %42, %cst_39 {dimension_numbers = #tpu.dot_dimension_numbers<[1], [0], [0], [1], [0, 0, 1, 1], [], []>} : vector<8x16xf32>, vector<16x8xf32>, vector<8x8xf32> -> vector<8x8xf32>
    %44 = vector.extract_strided_slice %7 {offsets = [0, 0], sizes = [8, 32], strides = [1, 1]} : vector<32x32xf32> to vector<8x32xf32>
    %cst_40 = arith.constant dense<0.000000e+00> : vector<8x32xf32>
    %45 = tpu.matmul %43, %44, %cst_40 {dimension_numbers = #tpu.dot_dimension_numbers<[1], [0], [0], [1], [0, 0, 1, 1], [], []>} : vector<8x8xf32>, vector<8x32xf32>, vector<8x32xf32> -> vector<8x32xf32>
    %46 = vector.extract_strided_slice %28 {offsets = [0, 8], sizes = [8, 8], strides = [1, 1]} : vector<8x32xf32> to vector<8x8xf32>
    %47 = vector.extract_strided_slice %22 {offsets = [0, 8], sizes = [16, 8], strides = [1, 1]} : vector<16x32xf32> to vector<16x8xf32>
    %cst_41 = arith.constant dense<0.000000e+00> : vector<8x16xf32>
    %48 = tpu.matmul %46, %47, %cst_41 {dimension_numbers = #tpu.dot_dimension_numbers<[1], [1], [0], [0], [0, 0, 1, 0], [], []>} : vector<8x8xf32>, vector<16x8xf32>, vector<8x16xf32> -> vector<8x16xf32>
    %cst_42 = arith.constant dense<0xFF800000> : vector<8xf32>
    %49 = vector.multi_reduction <maximumf>, %48, %cst_42 [1] : vector<8x16xf32> to vector<8xf32>
    %50 = vector.shape_cast %49 : vector<8xf32> to vector<8x1xf32>
    %51 = vector.broadcast %50 : vector<8x1xf32> to vector<8x16xf32>
    %52 = arith.subf %48, %51 : vector<8x16xf32>
    %53 = math.exp %52 : vector<8x16xf32>
    %cst_43 = arith.constant dense<0.000000e+00> : vector<8xf32>
    %54 = vector.multi_reduction <add>, %53, %cst_43 [1] : vector<8x16xf32> to vector<8xf32>
    %55 = vector.shape_cast %54 : vector<8xf32> to vector<8x1xf32>
    %56 = tpu.reciprocal %55 {approx = true} : vector<8x1xf32> -> vector<8x1xf32>
    %57 = vector.broadcast %56 : vector<8x1xf32> to vector<8x16xf32>
    %58 = arith.mulf %53, %57 : vector<8x16xf32>
    %59 = vector.extract_strided_slice %25 {offsets = [0, 8], sizes = [16, 8], strides = [1, 1]} : vector<16x32xf32> to vector<16x8xf32>
    %cst_44 = arith.constant dense<0.000000e+00> : vector<8x8xf32>
    %60 = tpu.matmul %58, %59, %cst_44 {dimension_numbers = #tpu.dot_dimension_numbers<[1], [0], [0], [1], [0, 0, 1, 1], [], []>} : vector<8x16xf32>, vector<16x8xf32>, vector<8x8xf32> -> vector<8x8xf32>
    %61 = vector.extract_strided_slice %7 {offsets = [8, 0], sizes = [8, 32], strides = [1, 1]} : vector<32x32xf32> to vector<8x32xf32>
    %cst_45 = arith.constant dense<0.000000e+00> : vector<8x32xf32>
    %62 = tpu.matmul %60, %61, %cst_45 {dimension_numbers = #tpu.dot_dimension_numbers<[1], [0], [0], [1], [0, 0, 1, 1], [], []>} : vector<8x8xf32>, vector<8x32xf32>, vector<8x32xf32> -> vector<8x32xf32>
    %63 = arith.addf %45, %62 : vector<8x32xf32>
    %64 = vector.extract_strided_slice %28 {offsets = [0, 16], sizes = [8, 8], strides = [1, 1]} : vector<8x32xf32> to vector<8x8xf32>
    %65 = vector.extract_strided_slice %22 {offsets = [0, 16], sizes = [16, 8], strides = [1, 1]} : vector<16x32xf32> to vector<16x8xf32>
    %cst_46 = arith.constant dense<0.000000e+00> : vector<8x16xf32>
    %66 = tpu.matmul %64, %65, %cst_46 {dimension_numbers = #tpu.dot_dimension_numbers<[1], [1], [0], [0], [0, 0, 1, 0], [], []>} : vector<8x8xf32>, vector<16x8xf32>, vector<8x16xf32> -> vector<8x16xf32>
    %cst_47 = arith.constant dense<0xFF800000> : vector<8xf32>
    %67 = vector.multi_reduction <maximumf>, %66, %cst_47 [1] : vector<8x16xf32> to vector<8xf32>
    %68 = vector.shape_cast %67 : vector<8xf32> to vector<8x1xf32>
    %69 = vector.broadcast %68 : vector<8x1xf32> to vector<8x16xf32>
    %70 = arith.subf %66, %69 : vector<8x16xf32>
    %71 = math.exp %70 : vector<8x16xf32>
    %cst_48 = arith.constant dense<0.000000e+00> : vector<8xf32>
    %72 = vector.multi_reduction <add>, %71, %cst_48 [1] : vector<8x16xf32> to vector<8xf32>
    %73 = vector.shape_cast %72 : vector<8xf32> to vector<8x1xf32>
    %74 = tpu.reciprocal %73 {approx = true} : vector<8x1xf32> -> vector<8x1xf32>
    %75 = vector.broadcast %74 : vector<8x1xf32> to vector<8x16xf32>
    %76 = arith.mulf %71, %75 : vector<8x16xf32>
    %77 = vector.extract_strided_slice %25 {offsets = [0, 16], sizes = [16, 8], strides = [1, 1]} : vector<16x32xf32> to vector<16x8xf32>
    %cst_49 = arith.constant dense<0.000000e+00> : vector<8x8xf32>
    %78 = tpu.matmul %76, %77, %cst_49 {dimension_numbers = #tpu.dot_dimension_numbers<[1], [0], [0], [1], [0, 0, 1, 1], [], []>} : vector<8x16xf32>, vector<16x8xf32>, vector<8x8xf32> -> vector<8x8xf32>
    %79 = vector.extract_strided_slice %7 {offsets = [16, 0], sizes = [8, 32], strides = [1, 1]} : vector<32x32xf32> to vector<8x32xf32>
    %cst_50 = arith.constant dense<0.000000e+00> : vector<8x32xf32>
    %80 = tpu.matmul %78, %79, %cst_50 {dimension_numbers = #tpu.dot_dimension_numbers<[1], [0], [0], [1], [0, 0, 1, 1], [], []>} : vector<8x8xf32>, vector<8x32xf32>, vector<8x32xf32> -> vector<8x32xf32>
    %81 = arith.addf %63, %80 : vector<8x32xf32>
    %82 = vector.extract_strided_slice %28 {offsets = [0, 24], sizes = [8, 8], strides = [1, 1]} : vector<8x32xf32> to vector<8x8xf32>
    %83 = vector.extract_strided_slice %22 {offsets = [0, 24], sizes = [16, 8], strides = [1, 1]} : vector<16x32xf32> to vector<16x8xf32>
    %cst_51 = arith.constant dense<0.000000e+00> : vector<8x16xf32>
    %84 = tpu.matmul %82, %83, %cst_51 {dimension_numbers = #tpu.dot_dimension_numbers<[1], [1], [0], [0], [0, 0, 1, 0], [], []>} : vector<8x8xf32>, vector<16x8xf32>, vector<8x16xf32> -> vector<8x16xf32>
    %cst_52 = arith.constant dense<0xFF800000> : vector<8xf32>
    %85 = vector.multi_reduction <maximumf>, %84, %cst_52 [1] : vector<8x16xf32> to vector<8xf32>
    %86 = vector.shape_cast %85 : vector<8xf32> to vector<8x1xf32>
    %87 = vector.broadcast %86 : vector<8x1xf32> to vector<8x16xf32>
    %88 = arith.subf %84, %87 : vector<8x16xf32>
    %89 = math.exp %88 : vector<8x16xf32>
    %cst_53 = arith.constant dense<0.000000e+00> : vector<8xf32>
    %90 = vector.multi_reduction <add>, %89, %cst_53 [1] : vector<8x16xf32> to vector<8xf32>
    %91 = vector.shape_cast %90 : vector<8xf32> to vector<8x1xf32>
    %92 = tpu.reciprocal %91 {approx = true} : vector<8x1xf32> -> vector<8x1xf32>
    %93 = vector.broadcast %92 : vector<8x1xf32> to vector<8x16xf32>
    %94 = arith.mulf %89, %93 : vector<8x16xf32>
    %95 = vector.extract_strided_slice %25 {offsets = [0, 24], sizes = [16, 8], strides = [1, 1]} : vector<16x32xf32> to vector<16x8xf32>
    %cst_54 = arith.constant dense<0.000000e+00> : vector<8x8xf32>
    %96 = tpu.matmul %94, %95, %cst_54 {dimension_numbers = #tpu.dot_dimension_numbers<[1], [0], [0], [1], [0, 0, 1, 1], [], []>} : vector<8x16xf32>, vector<16x8xf32>, vector<8x8xf32> -> vector<8x8xf32>
    %97 = vector.extract_strided_slice %7 {offsets = [24, 0], sizes = [8, 32], strides = [1, 1]} : vector<32x32xf32> to vector<8x32xf32>
    %cst_55 = arith.constant dense<0.000000e+00> : vector<8x32xf32>
    %98 = tpu.matmul %96, %97, %cst_55 {dimension_numbers = #tpu.dot_dimension_numbers<[1], [0], [0], [1], [0, 0, 1, 1], [], []>} : vector<8x8xf32>, vector<8x32xf32>, vector<8x32xf32> -> vector<8x32xf32>
    %99 = arith.addf %81, %98 : vector<8x32xf32>
    %100 = vector.broadcast %13 : vector<1x32xf32> to vector<8x32xf32>
    %101 = arith.addf %99, %100 : vector<8x32xf32>
    %102 = vector.broadcast %2 : f32 to vector<8x32xf32>
    %103 = arith.mulf %102, %17 : vector<8x32xf32>
    %cst_56 = arith.constant 1.000000e+00 : f32
    %104 = arith.subf %cst_56, %2 : f32
    %105 = vector.broadcast %104 : f32 to vector<8x32xf32>
    %106 = arith.mulf %105, %101 : vector<8x32xf32>
    %107 = arith.addf %103, %106 : vector<8x32xf32>
    %cst_57 = arith.constant dense<0.000000e+00> : vector<8xf32>
    %108 = vector.multi_reduction <add>, %107, %cst_57 [1] : vector<8x32xf32> to vector<8xf32>
    %109 = vector.shape_cast %108 : vector<8xf32> to vector<8x1xf32>
    %cst_58 = arith.constant 3.200000e+01 : f32
    %110 = vector.broadcast %cst_58 : f32 to vector<8x1xf32>
    %111 = arith.divf %109, %110 : vector<8x1xf32>
    %112 = vector.broadcast %111 : vector<8x1xf32> to vector<8x32xf32>
    %113 = arith.subf %107, %112 : vector<8x32xf32>
    %114 = arith.mulf %113, %113 : vector<8x32xf32>
    %cst_59 = arith.constant dense<0.000000e+00> : vector<8xf32>
    %115 = vector.multi_reduction <add>, %114, %cst_59 [1] : vector<8x32xf32> to vector<8xf32>
    %116 = vector.shape_cast %115 : vector<8xf32> to vector<8x1xf32>
    %cst_60 = arith.constant 3.200000e+01 : f32
    %117 = vector.broadcast %cst_60 : f32 to vector<8x1xf32>
    %118 = arith.divf %116, %117 : vector<8x1xf32>
    %cst_61 = arith.constant 9.99999996E-13 : f32
    %119 = vector.broadcast %cst_61 : f32 to vector<8x1xf32>
    %120 = arith.addf %118, %119 : vector<8x1xf32>
    %121 = math.rsqrt %120 : vector<8x1xf32>
    %122 = vector.broadcast %121 : vector<8x1xf32> to vector<8x32xf32>
    %123 = arith.mulf %113, %122 : vector<8x32xf32>
    %124 = vector.broadcast %0 : vector<1x32xf32> to vector<8x32xf32>
    %125 = arith.mulf %123, %124 : vector<8x32xf32>
    %126 = vector.broadcast %1 : vector<1x32xf32> to vector<8x32xf32>
    %127 = arith.addf %125, %126 : vector<8x32xf32>
    %cst_62 = arith.constant dense<0.000000e+00> : vector<8x64xf32>
    %128 = tpu.matmul %127, %8, %cst_62 {dimension_numbers = #tpu.dot_dimension_numbers<[1], [0], [0], [1], [0, 0, 1, 1], [], []>} : vector<8x32xf32>, vector<32x64xf32>, vector<8x64xf32> -> vector<8x64xf32>
    %129 = vector.broadcast %14 : vector<1x64xf32> to vector<8x64xf32>
    %130 = arith.addf %128, %129 : vector<8x64xf32>
    %cst_63 = arith.constant 0.000000e+00 : f32
    %131 = vector.broadcast %cst_63 : f32 to vector<8x64xf32>
    %132 = arith.maximumf %130, %131 : vector<8x64xf32>
    %cst_64 = arith.constant dense<0.000000e+00> : vector<8x32xf32>
    %133 = tpu.matmul %132, %9, %cst_64 {dimension_numbers = #tpu.dot_dimension_numbers<[1], [0], [0], [1], [0, 0, 1, 1], [], []>} : vector<8x64xf32>, vector<64x32xf32>, vector<8x32xf32> -> vector<8x32xf32>
    %134 = vector.broadcast %15 : vector<1x32xf32> to vector<8x32xf32>
    %135 = arith.addf %133, %134 : vector<8x32xf32>
    %136 = vector.broadcast %3 : f32 to vector<8x32xf32>
    %137 = arith.mulf %136, %127 : vector<8x32xf32>
    %cst_65 = arith.constant 1.000000e+00 : f32
    %138 = arith.subf %cst_65, %3 : f32
    %139 = vector.broadcast %138 : f32 to vector<8x32xf32>
    %140 = arith.mulf %139, %135 : vector<8x32xf32>
    %141 = arith.addf %137, %140 : vector<8x32xf32>
    %cst_66 = arith.constant dense<0.000000e+00> : vector<8xf32>
    %142 = vector.multi_reduction <add>, %141, %cst_66 [1] : vector<8x32xf32> to vector<8xf32>
    %143 = vector.shape_cast %142 : vector<8xf32> to vector<8x1xf32>
    %cst_67 = arith.constant 3.200000e+01 : f32
    %144 = vector.broadcast %cst_67 : f32 to vector<8x1xf32>
    %145 = arith.divf %143, %144 : vector<8x1xf32>
    %146 = vector.broadcast %145 : vector<8x1xf32> to vector<8x32xf32>
    %147 = arith.subf %141, %146 : vector<8x32xf32>
    %148 = arith.mulf %147, %147 : vector<8x32xf32>
    %cst_68 = arith.constant dense<0.000000e+00> : vector<8xf32>
    %149 = vector.multi_reduction <add>, %148, %cst_68 [1] : vector<8x32xf32> to vector<8xf32>
    %150 = vector.shape_cast %149 : vector<8xf32> to vector<8x1xf32>
    %cst_69 = arith.constant 3.200000e+01 : f32
    %151 = vector.broadcast %cst_69 : f32 to vector<8x1xf32>
    %152 = arith.divf %150, %151 : vector<8x1xf32>
    %cst_70 = arith.constant 9.99999996E-13 : f32
    %153 = vector.broadcast %cst_70 : f32 to vector<8x1xf32>
    %154 = arith.addf %152, %153 : vector<8x1xf32>
    %155 = math.rsqrt %154 : vector<8x1xf32>
    %156 = vector.broadcast %155 : vector<8x1xf32> to vector<8x32xf32>
    %157 = arith.mulf %147, %156 : vector<8x32xf32>
    %158 = vector.broadcast %0 : vector<1x32xf32> to vector<8x32xf32>
    %159 = arith.mulf %157, %158 : vector<8x32xf32>
    %160 = vector.broadcast %1 : vector<1x32xf32> to vector<8x32xf32>
    %161 = arith.addf %159, %160 : vector<8x32xf32>
    %c0_71 = arith.constant 0 : index
    %c0_72 = arith.constant 0 : index
    %c0_73 = arith.constant 0 : index
    %162 = vector.load %arg18[%c0_71, %c0_72, %c0_73] : memref<2x8x32xf32, #tpu.memory_space<vmem>>, vector<1x8x32xf32>
    %163 = vector.shape_cast %162 : vector<1x8x32xf32> to vector<8x32xf32>
    %164 = vector.shape_cast %161 : vector<8x32xf32> to vector<1x8x32xf32>
    tpu.vector_store %arg18[%c0_71, %c0_72, %c0_73], %164 {strides = array<i32>} : memref<2x8x32xf32, #tpu.memory_space<vmem>>, vector<1x8x32xf32>,
    %c1_74 = arith.constant 1 : index
    %c0_75 = arith.constant 0 : index
    %c0_76 = arith.constant 0 : index
    %165 = vector.load %arg2[%c1_74, %c0_75, %c0_76] : memref<2x8x32xf32, #tpu.memory_space<vmem>>, vector<1x8x32xf32>
    %166 = vector.shape_cast %165 : vector<1x8x32xf32> to vector<8x32xf32>
    %c1_77 = arith.constant 1 : index
    %c0_78 = arith.constant 0 : index
    %c0_79 = arith.constant 0 : index
    %167 = vector.load %arg3[%c1_77, %c0_78, %c0_79] : memref<2x16x32xf32, #tpu.memory_space<vmem>>, vector<1x16x32xf32>
    %168 = vector.shape_cast %167 : vector<1x16x32xf32> to vector<16x32xf32>
    %cst_80 = arith.constant dense<0.000000e+00> : vector<16x32xf32>
    %169 = tpu.matmul %168, %5, %cst_80 {dimension_numbers = #tpu.dot_dimension_numbers<[1], [0], [0], [1], [0, 0, 1, 1], [], []>} : vector<16x32xf32>, vector<32x32xf32>, vector<16x32xf32> -> vector<16x32xf32>
    %170 = vector.broadcast %11 : vector<1x32xf32> to vector<16x32xf32>
    %171 = arith.addf %169, %170 : vector<16x32xf32>
    %cst_81 = arith.constant dense<0.000000e+00> : vector<16x32xf32>
    %172 = tpu.matmul %168, %6, %cst_81 {dimension_numbers = #tpu.dot_dimension_numbers<[1], [0], [0], [1], [0, 0, 1, 1], [], []>} : vector<16x32xf32>, vector<32x32xf32>, vector<16x32xf32> -> vector<16x32xf32>
    %173 = vector.broadcast %12 : vector<1x32xf32> to vector<16x32xf32>
    %174 = arith.addf %172, %173 : vector<16x32xf32>
    %cst_82 = arith.constant dense<0.000000e+00> : vector<8x32xf32>
    %175 = tpu.matmul %166, %4, %cst_82 {dimension_numbers = #tpu.dot_dimension_numbers<[1], [0], [0], [1], [0, 0, 1, 1], [], []>} : vector<8x32xf32>, vector<32x32xf32>, vector<8x32xf32> -> vector<8x32xf32>
    %176 = vector.broadcast %10 : vector<1x32xf32> to vector<8x32xf32>
    %177 = arith.addf %175, %176 : vector<8x32xf32>
    %178 = vector.extract_strided_slice %177 {offsets = [0, 0], sizes = [8, 8], strides = [1, 1]} : vector<8x32xf32> to vector<8x8xf32>
    %179 = vector.extract_strided_slice %171 {offsets = [0, 0], sizes = [16, 8], strides = [1, 1]} : vector<16x32xf32> to vector<16x8xf32>
    %cst_83 = arith.constant dense<0.000000e+00> : vector<8x16xf32>
    %180 = tpu.matmul %178, %179, %cst_83 {dimension_numbers = #tpu.dot_dimension_numbers<[1], [1], [0], [0], [0, 0, 1, 0], [], []>} : vector<8x8xf32>, vector<16x8xf32>, vector<8x16xf32> -> vector<8x16xf32>
    %cst_84 = arith.constant dense<0xFF800000> : vector<8xf32>
    %181 = vector.multi_reduction <maximumf>, %180, %cst_84 [1] : vector<8x16xf32> to vector<8xf32>
    %182 = vector.shape_cast %181 : vector<8xf32> to vector<8x1xf32>
    %183 = vector.broadcast %182 : vector<8x1xf32> to vector<8x16xf32>
    %184 = arith.subf %180, %183 : vector<8x16xf32>
    %185 = math.exp %184 : vector<8x16xf32>
    %cst_85 = arith.constant dense<0.000000e+00> : vector<8xf32>
    %186 = vector.multi_reduction <add>, %185, %cst_85 [1] : vector<8x16xf32> to vector<8xf32>
    %187 = vector.shape_cast %186 : vector<8xf32> to vector<8x1xf32>
    %188 = tpu.reciprocal %187 {approx = true} : vector<8x1xf32> -> vector<8x1xf32>
    %189 = vector.broadcast %188 : vector<8x1xf32> to vector<8x16xf32>
    %190 = arith.mulf %185, %189 : vector<8x16xf32>
    %191 = vector.extract_strided_slice %174 {offsets = [0, 0], sizes = [16, 8], strides = [1, 1]} : vector<16x32xf32> to vector<16x8xf32>
    %cst_86 = arith.constant dense<0.000000e+00> : vector<8x8xf32>
    %192 = tpu.matmul %190, %191, %cst_86 {dimension_numbers = #tpu.dot_dimension_numbers<[1], [0], [0], [1], [0, 0, 1, 1], [], []>} : vector<8x16xf32>, vector<16x8xf32>, vector<8x8xf32> -> vector<8x8xf32>
    %193 = vector.extract_strided_slice %7 {offsets = [0, 0], sizes = [8, 32], strides = [1, 1]} : vector<32x32xf32> to vector<8x32xf32>
    %cst_87 = arith.constant dense<0.000000e+00> : vector<8x32xf32>
    %194 = tpu.matmul %192, %193, %cst_87 {dimension_numbers = #tpu.dot_dimension_numbers<[1], [0], [0], [1], [0, 0, 1, 1], [], []>} : vector<8x8xf32>, vector<8x32xf32>, vector<8x32xf32> -> vector<8x32xf32>
    %195 = vector.extract_strided_slice %177 {offsets = [0, 8], sizes = [8, 8], strides = [1, 1]} : vector<8x32xf32> to vector<8x8xf32>
    %196 = vector.extract_strided_slice %171 {offsets = [0, 8], sizes = [16, 8], strides = [1, 1]} : vector<16x32xf32> to vector<16x8xf32>
    %cst_88 = arith.constant dense<0.000000e+00> : vector<8x16xf32>
    %197 = tpu.matmul %195, %196, %cst_88 {dimension_numbers = #tpu.dot_dimension_numbers<[1], [1], [0], [0], [0, 0, 1, 0], [], []>} : vector<8x8xf32>, vector<16x8xf32>, vector<8x16xf32> -> vector<8x16xf32>
    %cst_89 = arith.constant dense<0xFF800000> : vector<8xf32>
    %198 = vector.multi_reduction <maximumf>, %197, %cst_89 [1] : vector<8x16xf32> to vector<8xf32>
    %199 = vector.shape_cast %198 : vector<8xf32> to vector<8x1xf32>
    %200 = vector.broadcast %199 : vector<8x1xf32> to vector<8x16xf32>
    %201 = arith.subf %197, %200 : vector<8x16xf32>
    %202 = math.exp %201 : vector<8x16xf32>
    %cst_90 = arith.constant dense<0.000000e+00> : vector<8xf32>
    %203 = vector.multi_reduction <add>, %202, %cst_90 [1] : vector<8x16xf32> to vector<8xf32>
    %204 = vector.shape_cast %203 : vector<8xf32> to vector<8x1xf32>
    %205 = tpu.reciprocal %204 {approx = true} : vector<8x1xf32> -> vector<8x1xf32>
    %206 = vector.broadcast %205 : vector<8x1xf32> to vector<8x16xf32>
    %207 = arith.mulf %202, %206 : vector<8x16xf32>
    %208 = vector.extract_strided_slice %174 {offsets = [0, 8], sizes = [16, 8], strides = [1, 1]} : vector<16x32xf32> to vector<16x8xf32>
    %cst_91 = arith.constant dense<0.000000e+00> : vector<8x8xf32>
    %209 = tpu.matmul %207, %208, %cst_91 {dimension_numbers = #tpu.dot_dimension_numbers<[1], [0], [0], [1], [0, 0, 1, 1], [], []>} : vector<8x16xf32>, vector<16x8xf32>, vector<8x8xf32> -> vector<8x8xf32>
    %210 = vector.extract_strided_slice %7 {offsets = [8, 0], sizes = [8, 32], strides = [1, 1]} : vector<32x32xf32> to vector<8x32xf32>
    %cst_92 = arith.constant dense<0.000000e+00> : vector<8x32xf32>
    %211 = tpu.matmul %209, %210, %cst_92 {dimension_numbers = #tpu.dot_dimension_numbers<[1], [0], [0], [1], [0, 0, 1, 1], [], []>} : vector<8x8xf32>, vector<8x32xf32>, vector<8x32xf32> -> vector<8x32xf32>
    %212 = arith.addf %194, %211 : vector<8x32xf32>
    %213 = vector.extract_strided_slice %177 {offsets = [0, 16], sizes = [8, 8], strides = [1, 1]} : vector<8x32xf32> to vector<8x8xf32>
    %214 = vector.extract_strided_slice %171 {offsets = [0, 16], sizes = [16, 8], strides = [1, 1]} : vector<16x32xf32> to vector<16x8xf32>
    %cst_93 = arith.constant dense<0.000000e+00> : vector<8x16xf32>
    %215 = tpu.matmul %213, %214, %cst_93 {dimension_numbers = #tpu.dot_dimension_numbers<[1], [1], [0], [0], [0, 0, 1, 0], [], []>} : vector<8x8xf32>, vector<16x8xf32>, vector<8x16xf32> -> vector<8x16xf32>
    %cst_94 = arith.constant dense<0xFF800000> : vector<8xf32>
    %216 = vector.multi_reduction <maximumf>, %215, %cst_94 [1] : vector<8x16xf32> to vector<8xf32>
    %217 = vector.shape_cast %216 : vector<8xf32> to vector<8x1xf32>
    %218 = vector.broadcast %217 : vector<8x1xf32> to vector<8x16xf32>
    %219 = arith.subf %215, %218 : vector<8x16xf32>
    %220 = math.exp %219 : vector<8x16xf32>
    %cst_95 = arith.constant dense<0.000000e+00> : vector<8xf32>
    %221 = vector.multi_reduction <add>, %220, %cst_95 [1] : vector<8x16xf32> to vector<8xf32>
    %222 = vector.shape_cast %221 : vector<8xf32> to vector<8x1xf32>
    %223 = tpu.reciprocal %222 {approx = true} : vector<8x1xf32> -> vector<8x1xf32>
    %224 = vector.broadcast %223 : vector<8x1xf32> to vector<8x16xf32>
    %225 = arith.mulf %220, %224 : vector<8x16xf32>
    %226 = vector.extract_strided_slice %174 {offsets = [0, 16], sizes = [16, 8], strides = [1, 1]} : vector<16x32xf32> to vector<16x8xf32>
    %cst_96 = arith.constant dense<0.000000e+00> : vector<8x8xf32>
    %227 = tpu.matmul %225, %226, %cst_96 {dimension_numbers = #tpu.dot_dimension_numbers<[1], [0], [0], [1], [0, 0, 1, 1], [], []>} : vector<8x16xf32>, vector<16x8xf32>, vector<8x8xf32> -> vector<8x8xf32>
    %228 = vector.extract_strided_slice %7 {offsets = [16, 0], sizes = [8, 32], strides = [1, 1]} : vector<32x32xf32> to vector<8x32xf32>
    %cst_97 = arith.constant dense<0.000000e+00> : vector<8x32xf32>
    %229 = tpu.matmul %227, %228, %cst_97 {dimension_numbers = #tpu.dot_dimension_numbers<[1], [0], [0], [1], [0, 0, 1, 1], [], []>} : vector<8x8xf32>, vector<8x32xf32>, vector<8x32xf32> -> vector<8x32xf32>
    %230 = arith.addf %212, %229 : vector<8x32xf32>
    %231 = vector.extract_strided_slice %177 {offsets = [0, 24], sizes = [8, 8], strides = [1, 1]} : vector<8x32xf32> to vector<8x8xf32>
    %232 = vector.extract_strided_slice %171 {offsets = [0, 24], sizes = [16, 8], strides = [1, 1]} : vector<16x32xf32> to vector<16x8xf32>
    %cst_98 = arith.constant dense<0.000000e+00> : vector<8x16xf32>
    %233 = tpu.matmul %231, %232, %cst_98 {dimension_numbers = #tpu.dot_dimension_numbers<[1], [1], [0], [0], [0, 0, 1, 0], [], []>} : vector<8x8xf32>, vector<16x8xf32>, vector<8x16xf32> -> vector<8x16xf32>
    %cst_99 = arith.constant dense<0xFF800000> : vector<8xf32>
    %234 = vector.multi_reduction <maximumf>, %233, %cst_99 [1] : vector<8x16xf32> to vector<8xf32>
    %235 = vector.shape_cast %234 : vector<8xf32> to vector<8x1xf32>
    %236 = vector.broadcast %235 : vector<8x1xf32> to vector<8x16xf32>
    %237 = arith.subf %233, %236 : vector<8x16xf32>
    %238 = math.exp %237 : vector<8x16xf32>
    %cst_100 = arith.constant dense<0.000000e+00> : vector<8xf32>
    %239 = vector.multi_reduction <add>, %238, %cst_100 [1] : vector<8x16xf32> to vector<8xf32>
    %240 = vector.shape_cast %239 : vector<8xf32> to vector<8x1xf32>
    %241 = tpu.reciprocal %240 {approx = true} : vector<8x1xf32> -> vector<8x1xf32>
    %242 = vector.broadcast %241 : vector<8x1xf32> to vector<8x16xf32>
    %243 = arith.mulf %238, %242 : vector<8x16xf32>
    %244 = vector.extract_strided_slice %174 {offsets = [0, 24], sizes = [16, 8], strides = [1, 1]} : vector<16x32xf32> to vector<16x8xf32>
    %cst_101 = arith.constant dense<0.000000e+00> : vector<8x8xf32>
    %245 = tpu.matmul %243, %244, %cst_101 {dimension_numbers = #tpu.dot_dimension_numbers<[1], [0], [0], [1], [0, 0, 1, 1], [], []>} : vector<8x16xf32>, vector<16x8xf32>, vector<8x8xf32> -> vector<8x8xf32>
    %246 = vector.extract_strided_slice %7 {offsets = [24, 0], sizes = [8, 32], strides = [1, 1]} : vector<32x32xf32> to vector<8x32xf32>
    %cst_102 = arith.constant dense<0.000000e+00> : vector<8x32xf32>
    %247 = tpu.matmul %245, %246, %cst_102 {dimension_numbers = #tpu.dot_dimension_numbers<[1], [0], [0], [1], [0, 0, 1, 1], [], []>} : vector<8x8xf32>, vector<8x32xf32>, vector<8x32xf32> -> vector<8x32xf32>
    %248 = arith.addf %230, %247 : vector<8x32xf32>
    %249 = vector.broadcast %13 : vector<1x32xf32> to vector<8x32xf32>
    %250 = arith.addf %248, %249 : vector<8x32xf32>
    %251 = vector.broadcast %2 : f32 to vector<8x32xf32>
    %252 = arith.mulf %251, %166 : vector<8x32xf32>
    %cst_103 = arith.constant 1.000000e+00 : f32
    %253 = arith.subf %cst_103, %2 : f32
    %254 = vector.broadcast %253 : f32 to vector<8x32xf32>
    %255 = arith.mulf %254, %250 : vector<8x32xf32>
    %256 = arith.addf %252, %255 : vector<8x32xf32>
    %cst_104 = arith.constant dense<0.000000e+00> : vector<8xf32>
    %257 = vector.multi_reduction <add>, %256, %cst_104 [1] : vector<8x32xf32> to vector<8xf32>
    %258 = vector.shape_cast %257 : vector<8xf32> to vector<8x1xf32>
    %cst_105 = arith.constant 3.200000e+01 : f32
    %259 = vector.broadcast %cst_105 : f32 to vector<8x1xf32>
    %260 = arith.divf %258, %259 : vector<8x1xf32>
    %261 = vector.broadcast %260 : vector<8x1xf32> to vector<8x32xf32>
    %262 = arith.subf %256, %261 : vector<8x32xf32>
    %263 = arith.mulf %262, %262 : vector<8x32xf32>
    %cst_106 = arith.constant dense<0.000000e+00> : vector<8xf32>
    %264 = vector.multi_reduction <add>, %263, %cst_106 [1] : vector<8x32xf32> to vector<8xf32>
    %265 = vector.shape_cast %264 : vector<8xf32> to vector<8x1xf32>
    %cst_107 = arith.constant 3.200000e+01 : f32
    %266 = vector.broadcast %cst_107 : f32 to vector<8x1xf32>
    %267 = arith.divf %265, %266 : vector<8x1xf32>
    %cst_108 = arith.constant 9.99999996E-13 : f32
    %268 = vector.broadcast %cst_108 : f32 to vector<8x1xf32>
    %269 = arith.addf %267, %268 : vector<8x1xf32>
    %270 = math.rsqrt %269 : vector<8x1xf32>
    %271 = vector.broadcast %270 : vector<8x1xf32> to vector<8x32xf32>
    %272 = arith.mulf %262, %271 : vector<8x32xf32>
    %273 = vector.broadcast %0 : vector<1x32xf32> to vector<8x32xf32>
    %274 = arith.mulf %272, %273 : vector<8x32xf32>
    %275 = vector.broadcast %1 : vector<1x32xf32> to vector<8x32xf32>
    %276 = arith.addf %274, %275 : vector<8x32xf32>
    %cst_109 = arith.constant dense<0.000000e+00> : vector<8x64xf32>
    %277 = tpu.matmul %276, %8, %cst_109 {dimension_numbers = #tpu.dot_dimension_numbers<[1], [0], [0], [1], [0, 0, 1, 1], [], []>} : vector<8x32xf32>, vector<32x64xf32>, vector<8x64xf32> -> vector<8x64xf32>
    %278 = vector.broadcast %14 : vector<1x64xf32> to vector<8x64xf32>
    %279 = arith.addf %277, %278 : vector<8x64xf32>
    %cst_110 = arith.constant 0.000000e+00 : f32
    %280 = vector.broadcast %cst_110 : f32 to vector<8x64xf32>
    %281 = arith.maximumf %279, %280 : vector<8x64xf32>
    %cst_111 = arith.constant dense<0.000000e+00> : vector<8x32xf32>
    %282 = tpu.matmul %281, %9, %cst_111 {dimension_numbers = #tpu.dot_dimension_numbers<[1], [0], [0], [1], [0, 0, 1, 1], [], []>} : vector<8x64xf32>, vector<64x32xf32>, vector<8x32xf32> -> vector<8x32xf32>
    %283 = vector.broadcast %15 : vector<1x32xf32> to vector<8x32xf32>
    %284 = arith.addf %282, %283 : vector<8x32xf32>
    %285 = vector.broadcast %3 : f32 to vector<8x32xf32>
    %286 = arith.mulf %285, %276 : vector<8x32xf32>
    %cst_112 = arith.constant 1.000000e+00 : f32
    %287 = arith.subf %cst_112, %3 : f32
    %288 = vector.broadcast %287 : f32 to vector<8x32xf32>
    %289 = arith.mulf %288, %284 : vector<8x32xf32>
    %290 = arith.addf %286, %289 : vector<8x32xf32>
    %cst_113 = arith.constant dense<0.000000e+00> : vector<8xf32>
    %291 = vector.multi_reduction <add>, %290, %cst_113 [1] : vector<8x32xf32> to vector<8xf32>
    %292 = vector.shape_cast %291 : vector<8xf32> to vector<8x1xf32>
    %cst_114 = arith.constant 3.200000e+01 : f32
    %293 = vector.broadcast %cst_114 : f32 to vector<8x1xf32>
    %294 = arith.divf %292, %293 : vector<8x1xf32>
    %295 = vector.broadcast %294 : vector<8x1xf32> to vector<8x32xf32>
    %296 = arith.subf %290, %295 : vector<8x32xf32>
    %297 = arith.mulf %296, %296 : vector<8x32xf32>
    %cst_115 = arith.constant dense<0.000000e+00> : vector<8xf32>
    %298 = vector.multi_reduction <add>, %297, %cst_115 [1] : vector<8x32xf32> to vector<8xf32>
    %299 = vector.shape_cast %298 : vector<8xf32> to vector<8x1xf32>
    %cst_116 = arith.constant 3.200000e+01 : f32
    %300 = vector.broadcast %cst_116 : f32 to vector<8x1xf32>
    %301 = arith.divf %299, %300 : vector<8x1xf32>
    %cst_117 = arith.constant 9.99999996E-13 : f32
    %302 = vector.broadcast %cst_117 : f32 to vector<8x1xf32>
    %303 = arith.addf %301, %302 : vector<8x1xf32>
    %304 = math.rsqrt %303 : vector<8x1xf32>
    %305 = vector.broadcast %304 : vector<8x1xf32> to vector<8x32xf32>
    %306 = arith.mulf %296, %305 : vector<8x32xf32>
    %307 = vector.broadcast %0 : vector<1x32xf32> to vector<8x32xf32>
    %308 = arith.mulf %306, %307 : vector<8x32xf32>
    %309 = vector.broadcast %1 : vector<1x32xf32> to vector<8x32xf32>
    %310 = arith.addf %308, %309 : vector<8x32xf32>
    %c1_118 = arith.constant 1 : index
    %c0_119 = arith.constant 0 : index
    %c0_120 = arith.constant 0 : index
    %311 = vector.load %arg18[%c1_118, %c0_119, %c0_120] : memref<2x8x32xf32, #tpu.memory_space<vmem>>, vector<1x8x32xf32>
    %312 = vector.shape_cast %311 : vector<1x8x32xf32> to vector<8x32xf32>
    %313 = vector.shape_cast %310 : vector<8x32xf32> to vector<1x8x32xf32>
    tpu.vector_store %arg18[%c1_118, %c0_119, %c0_120], %313 {strides = array<i32>} : memref<2x8x32xf32, #tpu.memory_space<vmem>>, vector<1x8x32xf32>,
    return
  }
  func.func @transform_0(%arg0: i32) -> i32 {
    %c0_i32 = arith.constant 0 : i32
    %c0_i32_0 = arith.constant 0 : i32
    return %c0_i32 : i32
  }
  func.func @transform_1(%arg0: i32) -> (i32, i32, i32) {
    %c0_i32 = arith.constant 0 : i32
    %c0_i32_0 = arith.constant 0 : i32
    %c0_i32_1 = arith.constant 0 : i32
    return %arg0, %c0_i32, %c0_i32_0 : i32, i32, i32
  }
  func.func @transform_2(%arg0: i32) -> (i32, i32, i32) {
    %c0_i32 = arith.constant 0 : i32
    %c0_i32_0 = arith.constant 0 : i32
    %c0_i32_1 = arith.constant 0 : i32
    return %arg0, %c0_i32, %c0_i32_0 : i32, i32, i32
  }
  func.func @transform_3(%arg0: i32) -> (i32, i32) {
    %c0_i32 = arith.constant 0 : i32
    %c0_i32_0 = arith.constant 0 : i32
    %c0_i32_1 = arith.constant 0 : i32
    return %c0_i32, %c0_i32_0 : i32, i32
  }
  func.func @transform_4(%arg0: i32) -> (i32, i32) {
    %c0_i32 = arith.constant 0 : i32
    %c0_i32_0 = arith.constant 0 : i32
    %c0_i32_1 = arith.constant 0 : i32
    return %c0_i32, %c0_i32_0 : i32, i32
  }
  func.func @transform_5(%arg0: i32) -> (i32, i32) {
    %c0_i32 = arith.constant 0 : i32
    %c0_i32_0 = arith.constant 0 : i32
    %c0_i32_1 = arith.constant 0 : i32
    return %c0_i32, %c0_i32_0 : i32, i32
  }
  func.func @transform_6(%arg0: i32) -> (i32, i32) {
    %c0_i32 = arith.constant 0 : i32
    %c0_i32_0 = arith.constant 0 : i32
    %c0_i32_1 = arith.constant 0 : i32
    return %c0_i32, %c0_i32_0 : i32, i32
  }
  func.func @transform_7(%arg0: i32) -> (i32, i32) {
    %c0_i32 = arith.constant 0 : i32
    %c0_i32_0 = arith.constant 0 : i32
    %c0_i32_1 = arith.constant 0 : i32
    return %c0_i32, %c0_i32_0 : i32, i32
  }
  func.func @transform_8(%arg0: i32) -> (i32, i32) {
    %c0_i32 = arith.constant 0 : i32
    %c0_i32_0 = arith.constant 0 : i32
    %c0_i32_1 = arith.constant 0 : i32
    return %c0_i32, %c0_i32_0 : i32, i32
  }
  func.func @transform_9(%arg0: i32) -> (i32, i32) {
    %c0_i32 = arith.constant 0 : i32
    %c0_i32_0 = arith.constant 0 : i32
    %c0_i32_1 = arith.constant 0 : i32
    return %c0_i32, %c0_i32_0 : i32, i32
  }
  func.func @transform_10(%arg0: i32) -> (i32, i32) {
    %c0_i32 = arith.constant 0 : i32
    %c0_i32_0 = arith.constant 0 : i32
    %c0_i32_1 = arith.constant 0 : i32
    return %c0_i32, %c0_i32_0 : i32, i32
  }
  func.func @transform_11(%arg0: i32) -> (i32, i32) {
    %c0_i32 = arith.constant 0 : i32
    %c0_i32_0 = arith.constant 0 : i32
    %c0_i32_1 = arith.constant 0 : i32
    return %c0_i32, %c0_i32_0 : i32, i32
  }
  func.func @transform_12(%arg0: i32) -> (i32, i32) {
    %c0_i32 = arith.constant 0 : i32
    %c0_i32_0 = arith.constant 0 : i32
    %c0_i32_1 = arith.constant 0 : i32
    return %c0_i32, %c0_i32_0 : i32, i32
  }
  func.func @transform_13(%arg0: i32) -> (i32, i32) {
    %c0_i32 = arith.constant 0 : i32
    %c0_i32_0 = arith.constant 0 : i32
    %c0_i32_1 = arith.constant 0 : i32
    return %c0_i32, %c0_i32_0 : i32, i32
  }
  func.func @transform_14(%arg0: i32) -> (i32, i32) {
    %c0_i32 = arith.constant 0 : i32
    %c0_i32_0 = arith.constant 0 : i32
    %c0_i32_1 = arith.constant 0 : i32
    return %c0_i32, %c0_i32_0 : i32, i32
  }
  func.func @transform_15(%arg0: i32) -> (i32, i32) {
    %c0_i32 = arith.constant 0 : i32
    %c0_i32_0 = arith.constant 0 : i32
    %c0_i32_1 = arith.constant 0 : i32
    return %c0_i32, %c0_i32_0 : i32, i32
  }
  func.func @transform_16(%arg0: i32) -> (i32, i32) {
    %c0_i32 = arith.constant 0 : i32
    %c0_i32_0 = arith.constant 0 : i32
    %c0_i32_1 = arith.constant 0 : i32
    return %c0_i32, %c0_i32_0 : i32, i32
  }
  func.func @transform_17(%arg0: i32) -> (i32, i32, i32) {
    %c0_i32 = arith.constant 0 : i32
    %c0_i32_0 = arith.constant 0 : i32
    %c0_i32_1 = arith.constant 0 : i32
    return %arg0, %c0_i32, %c0_i32_0 : i32, i32, i32
  }
}

</mosaic_0001>

<bundles_post_ra>
// kernel: tpu_custom_call.1
= control target key start
LH: loop header
LB: loop body
LE: loop exit
PB: predicated region body
PF: predicated region fallthrough
CT: control target
= control target key end

     0   :  { %s4518_s0 = inlined_call_operand.hbm [shape: f32[2], index: 0, kind: input, shape index: {}]   ;;  %s4519_s1 = inlined_call_operand.hbm [shape: f32[2,8,32], index: 1, kind: input, shape index: {}]   ;;  %s4520_s2 = inlined_call_operand.vmem [shape: f32[2,16,32], index: 2, kind: input, shape index: {}]   ;;  %s4521_s3 = inlined_call_operand.vmem [shape: f32[32,32], index: 3, kind: input, shape index: {}]   ;;  %s4522_s4 = inlined_call_operand.vmem [shape: f32[32,32], index: 4, kind: input, shape index: {}]   ;;  %s4523_s5 = inlined_call_operand.hbm [shape: f32[32,32], index: 5, kind: input, shape index: {}]   ;;  %s4524_s6 = inlined_call_operand.hbm [shape: f32[32,32], index: 6, kind: input, shape index: {}]   ;;  %s4525_s7 = inlined_call_operand.hbm [shape: f32[32,64], index: 7, kind: input, shape index: {}]   ;;  %s4526_s8 = inlined_call_operand.vmem [shape: f32[64,32], index: 8, kind: input, shape index: {}]   ;;  %s4527_s9 = inlined_call_operand.vmem [shape: f32[1,32], index: 9, kind: input, shape index: {}]   ;;  %s4528_s10 = inlined_call_operand.vmem [shape: f32[1,32], index: 10, kind: input, shape index: {}]   ;;  %s4529_s11 = inlined_call_operand.vmem [shape: f32[1,32], index: 11, kind: input, shape index: {}]   ;;  %s4530_s12 = inlined_call_operand.vmem [shape: f32[1,32], index: 12, kind: input, shape index: {}]   ;;  %s4531_s13 = inlined_call_operand.vmem [shape: f32[1,64], index: 13, kind: input, shape index: {}]   ;;  %s4532_s14 = inlined_call_operand.vmem [shape: f32[1,32], index: 14, kind: input, shape index: {}]   ;;  %s4533_s15 = inlined_call_operand.vmem [shape: f32[1,32], index: 15, kind: input, shape index: {}]   ;;  %s4534_s16 = inlined_call_operand.vmem [shape: f32[1,32], index: 16, kind: input, shape index: {}]   ;;  %s4535_s17 = inlined_call_operand.hbm [shape: f32[2,8,32], index: 17, kind: output, shape index: {}]  }
   0x1   :  { %4539 = sst [smem:[#allocation18_spill]] %s4518_s0 }
   0x2   :  { %4540 = sst [smem:[#allocation19_spill]] %s4519_s1 }
   0x3   :  { %4541 = sst [smem:[#allocation20_spill]] %s4532_s14 }
   0x4   :  { %4542 = sst [smem:[#allocation21_spill]] %s4535_s17 }
   0x5   :  { %22 = vsyncpa [#allocation5], 0 }
   0x6   :  { %23 = vsyncpa [#allocation3], 0 }
   0x7   :  { %24 = vsyncpa [#allocation8], 0 }
   0x8   :  { %25 = vsyncpa [#allocation11], 0 }
   0x9   :  { %26 = vsyncpa [#allocation4], 0  ;;  %s3876_s24 = smov [#allocation7]   ;;  %s3877_s26 = smov [#allocation6]  }
   0xa   :  { %s58_s25 = sshll.u32 %s3876_s24, 4  ;;  %s40_s27 = sshll.u32 %s3877_s26, 4  ;;  %s59_s25 = int_to_ptr.vmem [resolvable:$true] %s58_s25  ;;  %s41_s27 = int_to_ptr.vmem [resolvable:$true] %s40_s27 }
   0xb   :  { %s3746_s0 = scalar_lea.hbm %s4523_s5, 512 }
   0xc   :  { %p3747_p0 = scmp.ne.s32.totalorder %s4523_s5, %s3746_s0  ;;  %p3750_p1 = scmp.lt.u32.totalorder %s3746_s0, %s4523_s5 }
   0xe   :  { %p3752_p2 = pnand %p3750_p1, %p3747_p0 }
  0x10   :  { %3755 = shalt.err (!%p3752_p2)
}
  0x11   :  { %s3756_s20 = scalar_lea.vmem %s59_s25, 512  ;;  %p3761_p4 = scmp.lt.s32.totalorder %s59_s25, %s59_s25 }
  0x12   :  { %p3757_p3 = scmp.ne.s32.totalorder %s59_s25, %s3756_s20  ;;  %p3762_p5 = scmp.lt.s32.totalorder %s3756_s20, %s3756_s20 }
  0x14   :  { %p3763_p6 = por %p3762_p5, %p3761_p4 }
  0x16   :  { %p3764_p7 = pnand %p3763_p6, %p3757_p3 }
  0x18   :  { %3767 = shalt.err (!%p3764_p7)
}
  0x19   :  { %s3878_s21 = smov 128   ;;  %s3879_s22 = smov 8  }
  0x1a   :  { %64 = dma.hbm_to_vmem [thread:$0]  %s4523_s5, 512, %s59_s25, [#allocation8], %s3878_s21, %s3878_s21, %s3879_s22  }
  0x1b   :  { %s4543_s29 = sld [smem:[#allocation18_spill]] }
  0x21   :  { %s3768_s0 = scalar_lea.hbm %s4543_s29, 16 }
  0x22   :  { %p3769_p8 = scmp.ne.s32.totalorder %s4543_s29, %s3768_s0  ;;  %p3772_p9 = scmp.lt.u32.totalorder %s3768_s0, %s4543_s29 }
  0x24   :  { %p3774_p10 = pnand %p3772_p9, %p3769_p8 }
  0x26   :  { %3777 = shalt.err (!%p3774_p10)
}
  0x27   :  { %s3880_s20 = smov [#allocation2]   ;;  %s4544_s23 = sld [smem:[#allocation19_spill]] }
  0x28   :  { %34 = dma.hbm_to_smem %s4543_s29, 16, %s3880_s20, [#allocation5]  }
  0x2d   :  { %s3778_s24 = scalar_lea.hbm %s4544_s23, 256 }
  0x2e   :  { %p3779_p11 = scmp.ne.s32.totalorder %s4544_s23, %s3778_s24  ;;  %p3782_p12 = scmp.lt.u32.totalorder %s3778_s24, %s4544_s23 }
  0x30   :  { %p3784_p13 = pnand %p3782_p12, %p3779_p11 }
  0x32   :  { %3787 = shalt.err (!%p3784_p13)
}
  0x33   :  { %s3788_s0 = scalar_lea.vmem %s41_s27, 256  ;;  %p3793_p1 = scmp.lt.s32.totalorder %s41_s27, %s41_s27 }
  0x34   :  { %p3789_p0 = scmp.ne.s32.totalorder %s41_s27, %s3788_s0  ;;  %p3794_p2 = scmp.lt.s32.totalorder %s3788_s0, %s3788_s0 }
  0x36   :  { %p3795_p3 = por %p3794_p2, %p3793_p1 }
  0x38   :  { %p3796_p4 = pnand %p3795_p3, %p3789_p0 }
  0x3a   :  { %3799 = shalt.err (!%p3796_p4)
}
  0x3b   :  { %46 = dma.hbm_to_vmem [thread:$0]  %s4544_s23, 256, %s41_s27, [#allocation3], %s3878_s21, %s3878_s21, %s3879_s22  }
  0x3c   :  { %s3881_s29 = smov [#allocation9]   ;;  %s3882_s1 = smov [#allocation10]  }
  0x3d   :  { %s70_s19 = sshll.u32 %s3881_s29, 4  ;;  %s82_s20 = sshll.u32 %s3882_s1, 4  ;;  %s71_s19 = int_to_ptr.vmem [resolvable:$true] %s70_s19  ;;  %s83_s20 = int_to_ptr.vmem [resolvable:$true] %s82_s20 }
  0x3e   :  { %s3800_s24 = scalar_lea.hbm %s4524_s6, 512 }
  0x3f   :  { %p3801_p5 = scmp.ne.s32.totalorder %s4524_s6, %s3800_s24  ;;  %p3804_p6 = scmp.lt.u32.totalorder %s3800_s24, %s4524_s6 }
  0x41   :  { %p3806_p7 = pnand %p3804_p6, %p3801_p5 }
  0x43   :  { %3809 = shalt.err (!%p3806_p7)
}
  0x44   :  { %s3810_s27 = scalar_lea.vmem %s71_s19, 512  ;;  %p3815_p9 = scmp.lt.s32.totalorder %s71_s19, %s71_s19 }
  0x45   :  { %p3811_p8 = scmp.ne.s32.totalorder %s71_s19, %s3810_s27  ;;  %p3816_p10 = scmp.lt.s32.totalorder %s3810_s27, %s3810_s27 }
  0x47   :  { %p3817_p11 = por %p3816_p10, %p3815_p9 }
  0x49   :  { %p3818_p12 = pnand %p3817_p11, %p3811_p8 }
  0x4b   :  { %3821 = shalt.err (!%p3818_p12)
}
  0x4c   :  { %76 = dma.hbm_to_vmem [thread:$0]  %s4524_s6, 512, %s71_s19, [#allocation8], %s3878_s21, %s3878_s21, %s3879_s22  }
  0x4d   :  { %s3822_s29 = scalar_lea.hbm %s4525_s7, 512 }
  0x4e   :  { %p3823_p13 = scmp.ne.s32.totalorder %s4525_s7, %s3822_s29  ;;  %p3826_p0 = scmp.lt.u32.totalorder %s3822_s29, %s4525_s7 }
  0x50   :  { %p3828_p1 = pnand %p3826_p0, %p3823_p13 }
  0x52   :  { %3831 = shalt.err (!%p3828_p1)
}
  0x53   :  { %s3832_s26 = scalar_lea.vmem %s83_s20, 512  ;;  %p3837_p3 = scmp.lt.s32.totalorder %s83_s20, %s83_s20 }
  0x54   :  { %p3833_p2 = scmp.ne.s32.totalorder %s83_s20, %s3832_s26  ;;  %p3838_p4 = scmp.lt.s32.totalorder %s3832_s26, %s3832_s26 }
  0x56   :  { %p3839_p5 = por %p3838_p4, %p3837_p3 }
  0x58   :  { %p3840_p6 = pnand %p3839_p5, %p3833_p2 }
  0x5a   :  { %3843 = shalt.err (!%p3840_p6)
}
  0x5b   :  { %88 = dma.hbm_to_vmem [thread:$0]  %s4525_s7, 512, %s83_s20, [#allocation11], %s3878_s21, %s3878_s21, %s3879_s22  }
  0x5c   :  { %3866 = dma.done.wait [#allocation5], 16  }
  0x5d   :  { %3867 = vsyncadd [#allocation5], 4294967280 }
  0x5e   :  { %3868 = dma.done.wait [#allocation3], 256  }
  0x5f   :  { %3869 = vsyncadd [#allocation3], 4294967040 }
  0x60   :  { %3870 = dma.done.wait [#allocation8], 1024  }
  0x61   :  { %3871 = vsyncadd [#allocation8], 4294966272 }
  0x62   :  { %3872 = dma.done.wait [#allocation11], 512  }
  0x63   :  { %3873 = vsyncadd [#allocation11], 4294966784 }
  0x64   :  { %122 = sfence }
  0x65   :  { %v131_v0 = vld [vmem:[%s4522_s4] sm:$0xff]  ;;  %v132_v1 = vld [vmem:[%s4522_s4 + $0x8] sm:$0xff]  ;;  %v133_v2 = vld [vmem:[%s4522_s4 + $0x10] sm:$0xff]  ;;  %vm170_vm0 = vcmask 261120   ;;  %v3883_v17 = vmov 0.0|0.0   ;;  %vm3884_vm1 = vmmov 0  }
  0x66   :  { %v4061_v3 = vpack.c.bf16 %v132_v1, %v131_v0  ;;  %v134_v4 = vld [vmem:[%s4522_s4 + $0x18] sm:$0xff]  ;;  %v162_v5 = vld [vmem:[%s4520_s2] sm:$0xff]  ;;  %v135_v7 = vld [vmem:[#allocation7] sm:$0xff]  ;;  %v3885_v21 = vmov 0.0   ;;  %vm412_vm2 = vcmask 64512   ;;  %s3886_s18 = smov 120  }
  0x67   :  { %v4069_v6 = vpack.c.bf16 %v134_v4, %v133_v2  ;;  %3226 = vmatprep.mubr.msk.f32.mxu0 %vm170_vm0, %v162_v5  ;;  %3237 = vmatprep.mubr.msk.f32.mxu1 %vm170_vm0, %v162_v5  ;;  %v136_v8 = vld [vmem:[#allocation7 + $0x8] sm:$0xff]  ;;  %v137_v9 = vld [vmem:[#allocation7 + $0x10] sm:$0xff]  ;;  %v138_v10 = vld [vmem:[#allocation7 + $0x18] sm:$0xff]  ;;  %vm492_vm4 = vcmask 130048   ;;  %s4238_s7 = sld [smem:[#allocation2]]  ;;  %vm1516_vm5 = vcmask 523264  }
  0x68   :  { %3497 = vmatprep.subr.bf16.mxu0 %v4061_v3  ;;  %v127_v11 = vld [vmem:[%s4521_s3] sm:$0xff]  ;;  %v128_v12 = vld [vmem:[%s4521_s3 + $0x8] sm:$0xff]  ;;  %v4082_v13 = vpack.c.bf16 %v136_v8, %v135_v7  ;;  %v4084_v14 = vpack.c.bf16 %v138_v10, %v137_v9  ;;  %v129_v18 = vld [vmem:[%s4521_s3 + $0x10] sm:$0xff]  ;;  %s4547_s25 = sld [smem:[#allocation20_spill]] }
  0x69   :  { %3499 = vmatpush3.bf16.msra.mxu0 %v4061_v3  ;;  %v163_v15 = vld [vmem:[%s4520_s2 + $0x8] sm:$0xff]  ;;  %v4091_v16 = vpack.c.bf16 %v128_v12, %v127_v11  ;;  %v130_v19 = vld [vmem:[%s4521_s3 + $0x18] sm:$0xff]  ;;  %v4112_v22 = vld [vmem:[#allocation6] sm:$0xff] }
  0x6a   :  { %3501 = vmatprep.subr.bf16.mxu0 %v4069_v6  ;;  %3505 = vmatprep.subr.bf16.mxu1 %v4082_v13  ;;  %v4104_v20 = vpack.c.bf16 %v130_v19, %v129_v18  ;;  %v4125_v23 = vld [vmem:[%s4528_s10] ss:$0 sm:$0xff]  ;;  %vm4131_vm3 = vmpackc.low %vm412_vm2, %vm412_vm2  ;;  %v4179_v11 = vld [vmem:[#allocation9 + $0x8] sm:$0xff] }
  0x6b   :  { %3507 = vmatpush3.bf16.msra.mxu1 %v4082_v13  ;;  %v4141_v32 = vld [vmem:[%s4527_s9] ss:$0 sm:$0xff]  ;;  %s3887_s9 = smov 104   ;;  %v4186_v19 = vld [vmem:[#allocation9] sm:$0xff] }
  0x6c   :  { %3509 = vmatprep.subr.bf16.mxu1 %v4084_v14  ;;  %v4152_v37 = vld [vmem:[%s4529_s11] ss:$0 sm:$0xff]  ;;  %s3888_s11 = smov 112  }
  0x6d   :  { %3503 = vmatpush3.bf16.msra.mxu0 %v4069_v6  ;;  %s1398_s20 = ssub.f32 1.0, %s4238_s7 }
  0x6e   :  { %3512 = vmatprep.subr.bf16.mxu0 %v3883_v17 }
  0x6f   :  { %3511 = vmatpush3.bf16.msra.mxu1 %v4084_v14 }
  0x70   :  { %3227 = vmatmul.mubr.msk.f32.vlgmr.msra.gmra.mrb[0].mxu0 %vm170_vm0, %v163_v15  ;;  %3518 = vmatprep.subr.bf16.mxu1 %v3883_v17 }
  0x71   :  { %3514 = vmatpush3.bf16.msra.mxu0 %v4091_v16  ;;  %3248 = vmatprep.mubr.msk.f32.mxu0 %vm3884_vm1, %v3885_v21 }
  0x72   :  { %3515 = vmatprep.subr.bf16.mxu0 %v3883_v17  ;;  %3238 = vmatmul.mubr.msk.f32.vlgmr.msra.gmra.mrb[0].mxu1 %vm170_vm0, %v163_v15 }
  0x73   :  { %3255 = vmatprep.mubr.msk.f32.mxu1 %vm3884_vm1, %v3885_v21 }
  0x75   :  { %3517 = vmatpush3.bf16.msra.mxu0 %v4104_v20 }
  0x76   :  { %3522 = vmatprep.subr.bf16.mxu0 %v3883_v17 }
  0x78   :  { %3249 = vmatmul.mubr.msk.f32.vlgmr.msra.gmra.mrb[2].mxu0 %vm170_vm0, %v4112_v22 }
  0x79   :  { %3262 = vmatprep.mubr.msk.f32.mxu0 %vm3884_vm1, %v3885_v21 }
 0x143   :  { %v3228_v24 = vpop.f32.mrb[0].mxu0 }
 0x144   :  { %v249_v25 = vadd.f32 %v3228_v24, %v4125_v23  ;;  %v243_v26 = vpop.f32.mrb[1].mxu0 }
 0x145   :  { %v244_v27 = vadd.f32 %v4125_v23, %v243_v26  ;;  %v3239_v31 = vpop.f32.mrb[0].mxu1 }
 0x146   :  { %v324_v33 = vpop.f32.mrb[1].mxu1  ;;  %v330_v38 = vadd.f32 %v3239_v31, %v4152_v37 }
 0x147   :  { %v3519_v29 = vpack.c.bf16 %v249_v25, %v244_v27  ;;  %v3646_v30 = vpack.i.bf16 %v249_v25, %v244_v27  ;;  %v325_v39 = vadd.f32 %v4152_v37, %v324_v33 }
 0x149   :  { %3647 = vrot.lane.b32.xlu0 %v3646_v30, %s3886_s18  ;;  %3521 = vmatpush3.bf16.xpose.msk.msra.mxu1 %vm4131_vm3, %v3519_v29  ;;  %v3523_v40 = vpack.c.bf16 %v330_v38, %v325_v39  ;;  %v4168_v62 = vpack.i.bf16 %v330_v38, %v325_v39 }
 0x14a   :  { %3525 = vmatprep.subr.bf16.mxu1 %v3883_v17 }
 0x14b   :  { %v408_v34 = vpop.f32.mrb[2].mxu0  ;;  %3524 = vmatpush3.bf16.msra.mxu0 %v3523_v40 }
 0x14c   :  { %v409_v35 = vadd.f32 %v4141_v32, %v408_v34  ;;  %v3250_v36 = vpop.f32.mrb[3].mxu0  ;;  %3529 = vmatprep.subr.bf16.mxu0 %v3883_v17 }
 0x14e   :  { %577 = vrot.lane.b32.xlu0 %v409_v35, %s3886_s18 }
 0x150   :  { %3256 = vmatmul.mubr.msk.f32.vlgmr.msra.gmra.mrb[2].mxu1 %vm412_vm2, %v409_v35 }
 0x151   :  { %3269 = vmatprep.mubr.msk.f32.mxu1 %vm3884_vm1, %v3885_v21 }
 0x1bb   :  { %v3648_v41 = vpop.permute.xlu0 %3647 }
 0x1bc   :  { %v3650_v42 = vunpack.i.h.bf16 %v3648_v41  ;;  %v3649_v43 = vunpack.i.l.bf16 %v3648_v41 }
 0x1be   :  { %v3526_v44 = vpack.c.bf16 %v3650_v42, %v3649_v43 }
 0x1c0   :  { %3528 = vmatpush3.bf16.xpose.msk.msra.mxu1 %vm4131_vm3, %v3526_v44  ;;  %v578_v45 = vpop.permute.xlu0 %577 }
 0x1c1   :  { %3536 = vmatprep.subr.bf16.mxu1 %v3883_v17 }
 0x1c7   :  { %3270 = vmatmul.mubr.msk.f32.vlgmr.msra.gmra.mrb[4].mxu1 %vm412_vm2, %v578_v45 }
 0x1c8   :  { %3300 = vmatprep.mubr.msk.f32.mxu1 %vm3884_vm1, %v3885_v21 }
 0x223   :  { %v488_v46 = vpop.f32.mrb[2].mxu1 }
 0x224   :  { %v493_v47 = vsel %vm492_vm4, %v488_v46, -inf  ;;  %v3257_v48 = vpop.f32.mrb[3].mxu1 }
 0x225   :  { %494 = vmax.xlane.f32.xlu1 %v493_v47 }
 0x29a   :  { %v655_v49 = vpop.f32.mrb[4].mxu1 }
 0x29b   :  { %v3271_v50 = vpop.f32.mrb[5].mxu1  ;;  %v659_v51 = vsel %vm492_vm4, %v655_v49, -inf }
 0x29c   :  { %660 = vmax.xlane.f32.xlu1 %v659_v51 }
 0x2b2   :  { %v495_v52 = vpop.xlane.xlu1 %494 }
 0x2b3   :  { %v496_v53 = vsub.f32 %v488_v46, %v495_v52 }
 0x2b5   :  { %v497_v54 = vmul.f32 1.442695, %v496_v53 }
 0x2b7   :  { %3706 = vpow2.f32 %v497_v54 }
 0x2c1   :  { %v3707_v55 = vpop.eup %3706 }
 0x2c2   :  { %v499_v56 = vsel %vm492_vm4, %v3707_v55, 0.0 }
 0x2c3   :  { %500 = vadd.xlane.f32.xlu0 %v499_v56 }
 0x2d9   :  { %1143 = vrot.lane.b32.xlu0 %v409_v35, %s3887_s9 }
 0x329   :  { %v661_v57 = vpop.xlane.xlu1 %660 }
 0x32a   :  { %v662_v58 = vsub.f32 %v655_v49, %v661_v57 }
 0x32c   :  { %v663_v59 = vmul.f32 1.442695, %v662_v58 }
 0x32e   :  { %3708 = vpow2.f32 %v663_v59 }
 0x338   :  { %v3709_v60 = vpop.eup %3708 }
 0x339   :  { %v665_v61 = vsel %vm492_vm4, %v3709_v60, 0.0 }
 0x33a   :  { %666 = vadd.xlane.f32.xlu1 %v665_v61 }
 0x34b   :  { %3652 = vrot.lane.b32.xlu1 %v4168_v62, %s3886_s18 }
 0x34f   :  { %3657 = vrot.lane.b32.xlu1 %v3646_v30, %s3888_s11 }
 0x350   :  { %v501_v63 = vpop.xlane.xlu0 %500 }
 0x351   :  { %3710 = vrcp.f32 %v501_v63 }
 0x353   :  { %897 = vrot.lane.b32.xlu1 %v409_v35, %s3888_s11 }
 0x354   :  { %v1144_v36 = vpop.permute.xlu0 %1143 }
 0x357   :  { %3662 = vrot.lane.b32.xlu1 %v3646_v30, %s3887_s9 }
 0x35b   :  { %v3711_v0 = vpop.eup %3710 }
 0x35c   :  { %v503_v1 = vmul.f32 %v3711_v0, %v3707_v55 }
 0x35e   :  { %3263 = vmatmul.mubr.msk.f32.vlgmr.msra.gmra.mrb[4].mxu0 %vm492_vm4, %v503_v1 }
 0x35f   :  { %3276 = vmatprep.mubr.msk.f32.mxu0 %vm3884_vm1, %v3885_v21 }
 0x3c7   :  { %v667_v2 = vpop.xlane.xlu1 %666 }
 0x3c8   :  { %3712 = vrcp.f32 %v667_v2 }
 0x3cb   :  { %v3653_v4 = vpop.permute.xlu1 %3652 }
 0x3cc   :  { %v3655_v5 = vunpack.i.h.bf16 %v3653_v4  ;;  %v3654_v7 = vunpack.i.l.bf16 %v3653_v4  ;;  %v4220_v4 = vld [vmem:[#allocation9 + $0x10] sm:$0xff] }
 0x3ce   :  { %v3530_v8 = vpack.c.bf16 %v3655_v5, %v3654_v7 }
 0x3cf   :  { %v3658_v18 = vpop.permute.xlu1 %3657 }
 0x3d0   :  { %3531 = vmatpush3.bf16.msra.mxu0 %v3530_v8  ;;  %v3660_v27 = vunpack.i.h.bf16 %v3658_v18  ;;  %v3659_v29 = vunpack.i.l.bf16 %v3658_v18 }
 0x3d1   :  { %3279 = vmatprep.subr.mxu0 %v3885_v21 }
 0x3d2   :  { %v3713_v9 = vpop.eup %3712  ;;  %v3533_v30 = vpack.c.bf16 %v3660_v27, %v3659_v29 }
 0x3d3   :  { %v669_v10 = vmul.f32 %v3713_v9, %v3709_v60  ;;  %v898_v26 = vpop.permute.xlu1 %897 }
 0x3d5   :  { %3277 = vmatmul.mubr.msk.f32.vlgmr.msra.gmra.mrb[6].mxu0 %vm492_vm4, %v669_v10 }
 0x3d6   :  { %3280 = vmatpush3.msra.mxu0 %v4179_v11  ;;  %3281 = vmatprep.mubr.msk.f32.mxu0 %vm3884_vm1, %v3885_v21 }
 0x3d7   :  { %3284 = vmatprep.subr.mxu0 %v3885_v21  ;;  %v3663_v31 = vpop.permute.xlu1 %3662 }
 0x3d8   :  { %v3665_v33 = vunpack.i.h.bf16 %v3663_v31  ;;  %v3664_v34 = vunpack.i.l.bf16 %v3663_v31  ;;  %v4244_v31 = vld [vmem:[%s4530_s12] ss:$0 sm:$0xff] }
 0x3da   :  { %v3540_v35 = vpack.c.bf16 %v3665_v33, %v3664_v34  ;;  %v1396_v34 = vstv %s4238_s7 }
 0x431   :  { %v573_v12 = vpop.f32.mrb[4].mxu0 }
 0x432   :  { %v3264_v15 = vpop.f32.mrb[5].mxu0 }
 0x4a8   :  { %v747_v24 = vpop.f32.mrb[6].mxu0 }
 0x4a9   :  { %v3278_v25 = vpop.f32.mrb[7].mxu0  ;;  %3282 = vmatmul.mubr.msk.f32.vlgmr.msra.gmra.mrb[8].mxu0 %vm412_vm2, %v747_v24  ;;  %v4231_v24 = vld [vmem:[#allocation9 + $0x18] sm:$0xff] }
 0x4aa   :  { %3285 = vmatpush3.msra.mxu0 %v4186_v19  ;;  %3286 = vmatprep.mubr.msk.f32.mxu0 %vm3884_vm1, %v3885_v21 }
 0x4ab   :  { %3532 = vmatprep.subr.bf16.mxu0 %v3883_v17 }
 0x4ad   :  { %3287 = vmatmul.mubr.msk.f32.vlgmr.msra.gmra.mrb[10].mxu0 %vm412_vm2, %v573_v12 }
 0x4ae   :  { %3293 = vmatprep.mubr.msk.f32.mxu0 %vm3884_vm1, %v3885_v21 }
 0x4b1   :  { %3535 = vmatpush3.bf16.xpose.msk.msra.mxu0 %vm4131_vm3, %v3533_v30 }
 0x4b2   :  { %3539 = vmatprep.subr.bf16.mxu0 %v3883_v17 }
 0x4b8   :  { %3294 = vmatmul.mubr.msk.f32.vlgmr.msra.gmra.mrb[12].mxu0 %vm412_vm2, %v898_v26 }
 0x4b9   :  { %3542 = vmatpush3.bf16.xpose.msk.msra.mxu0 %vm4131_vm3, %v3540_v35  ;;  %3312 = vmatprep.mubr.msk.f32.mxu0 %vm3884_vm1, %v3885_v21 }
 0x4ba   :  { %3546 = vmatprep.subr.bf16.mxu0 %v3883_v17 }
 0x4c0   :  { %3313 = vmatmul.mubr.msk.f32.vlgmr.msra.gmra.mrb[14].mxu0 %vm412_vm2, %v1144_v36 }
 0x4c1   :  { %3335 = vmatprep.mubr.msk.f32.mxu0 %vm3884_vm1, %v3885_v21 }
 0x57c   :  { %v820_v38 = vpop.f32.mrb[8].mxu0 }
 0x57d   :  { %v3283_v39 = vpop.f32.mrb[9].mxu0 }
 0x580   :  { %v893_v40 = vpop.f32.mrb[10].mxu0 }
 0x581   :  { %v894_v41 = vadd.f32 %v893_v40, %v820_v38  ;;  %v3288_v42 = vpop.f32.mrb[11].mxu0  ;;  %v4247_v38 = vstv %s1398_s20  ;;  %v1397_v40 = vmul.f32 %v1396_v34, %v4112_v22  ;;  %v145_v22 = vld [vmem:[#allocation10 + $0x10] sm:$0xff] }
 0x58b   :  { %v975_v43 = vpop.f32.mrb[12].mxu0 }
 0x58c   :  { %v3295_v44 = vpop.f32.mrb[13].mxu0  ;;  %v979_v45 = vsel %vm492_vm4, %v975_v43, -inf }
 0x58d   :  { %980 = vmax.xlane.f32.xlu1 %v979_v45 }
 0x593   :  { %v1221_v46 = vpop.f32.mrb[14].mxu0 }
 0x594   :  { %v3314_v47 = vpop.f32.mrb[15].mxu0  ;;  %v1225_v57 = vsel %vm492_vm4, %v1221_v46, -inf }
 0x59e   :  { %3667 = vrot.lane.b32.xlu1 %v4168_v62, %s3888_s11 }
 0x61a   :  { %v981_v48 = vpop.xlane.xlu1 %980 }
 0x61b   :  { %v982_v49 = vsub.f32 %v975_v43, %v981_v48 }
 0x61d   :  { %v983_v50 = vmul.f32 1.442695, %v982_v49  ;;  %v143_v49 = vld [vmem:[#allocation10] sm:$0xff] }
 0x61e   :  { %v3668_v51 = vpop.permute.xlu1 %3667 }
 0x61f   :  { %3714 = vpow2.f32 %v983_v50  ;;  %v3670_v52 = vunpack.i.h.bf16 %v3668_v51  ;;  %v3669_v53 = vunpack.i.l.bf16 %v3668_v51  ;;  %v144_v50 = vld [vmem:[#allocation10 + $0x8] sm:$0xff] }
 0x620   :  { %v4256_v51 = vpack.c.bf16 %v144_v50, %v143_v49 }
 0x621   :  { %v3537_v54 = vpack.c.bf16 %v3670_v52, %v3669_v53  ;;  %v146_v52 = vld [vmem:[#allocation10 + $0x18] sm:$0xff] }
 0x622   :  { %3548 = vmatpush3.bf16.msra.mxu0 %v4256_v51  ;;  %v4260_v53 = vpack.c.bf16 %v146_v52, %v145_v22 }
 0x623   :  { %3538 = vmatpush3.bf16.msra.mxu1 %v3537_v54  ;;  %3549 = vmatprep.subr.bf16.mxu0 %v3883_v17  ;;  %v147_v54 = vld [vmem:[%s4526_s8] sm:$0xff] }
 0x624   :  { %3303 = vmatprep.subr.mxu1 %v3885_v21 }
 0x626   :  { %3551 = vmatpush3.bf16.msra.mxu0 %v4260_v53 }
 0x627   :  { %3565 = vmatprep.subr.bf16.mxu0 %v4061_v3 }
 0x629   :  { %v3715_v55 = vpop.eup %3714 }
 0x62a   :  { %v985_v56 = vsel %vm492_vm4, %v3715_v55, 0.0 }
 0x62b   :  { %986 = vadd.xlane.f32.xlu0 %v985_v56  ;;  %v149_v56 = vld [vmem:[%s4526_s8 + $0x10] sm:$0xff] }
 0x62f   :  { %1226 = vmax.xlane.f32.xlu0 %v1225_v57 }
 0x645   :  { %3672 = vrot.lane.b32.xlu0 %v4168_v62, %s3887_s9 }
 0x6b8   :  { %v987_v58 = vpop.xlane.xlu0 %986 }
 0x6b9   :  { %3716 = vrcp.f32 %v987_v58  ;;  %v150_v58 = vld [vmem:[%s4526_s8 + $0x18] sm:$0xff] }
 0x6bc   :  { %v1227_v59 = vpop.xlane.xlu0 %1226 }
 0x6bd   :  { %v1228_v60 = vsub.f32 %v1221_v46, %v1227_v59  ;;  %v4279_v59 = vpack.c.bf16 %v150_v58, %v149_v56 }
 0x6bf   :  { %v1229_v61 = vmul.f32 1.442695, %v1228_v60  ;;  %v151_v60 = vld [vmem:[%s4526_s8 + $0x20] sm:$0xff] }
 0x6c0   :  { %v3673_v5 = vpop.permute.xlu0 %3672 }
 0x6c1   :  { %3718 = vpow2.f32 %v1229_v61  ;;  %v3675_v7 = vunpack.i.h.bf16 %v3673_v5  ;;  %v3674_v8 = vunpack.i.l.bf16 %v3673_v5  ;;  %v152_v61 = vld [vmem:[%s4526_s8 + $0x28] sm:$0xff]  ;;  %v4297_v5 = vld [vmem:[%s4533_s15] ss:$0 sm:$0xff] }
 0x6c3   :  { %v3717_v63 = vpop.eup %3716  ;;  %v3544_v10 = vpack.c.bf16 %v3675_v7, %v3674_v8  ;;  %v4302_v8 = vld [vmem:[%s4534_s16] ss:$0 sm:$0xff] }
 0x6c4   :  { %v989_v0 = vmul.f32 %v3717_v63, %v3715_v55  ;;  %v148_v55 = vld [vmem:[%s4526_s8 + $0x8] sm:$0xff]  ;;  %v4289_v63 = vpack.c.bf16 %v152_v61, %v151_v60 }
 0x6c5   :  { %v4273_v57 = vpack.c.bf16 %v148_v55, %v147_v54 }
 0x6c6   :  { %3301 = vmatmul.mubr.msk.f32.vlgmr.msra.gmra.mrb[6].mxu1 %vm492_vm4, %v989_v0 }
 0x6c7   :  { %3305 = vmatprep.mubr.msk.f32.mxu1 %vm3884_vm1, %v3885_v21  ;;  %3304 = vmatpush3.msra.mxu1 %v4220_v4 }
 0x6c8   :  { %3543 = vmatprep.subr.bf16.mxu1 %v3883_v17 }
 0x6cb   :  { %v3719_v1 = vpop.eup %3718 }
 0x6cc   :  { %v1231_v2 = vsel %vm492_vm4, %v3719_v1, 0.0 }
 0x6cd   :  { %1232 = vadd.xlane.f32.xlu1 %v1231_v2 }
 0x75a   :  { %v1233_v62 = vpop.xlane.xlu1 %1232 }
 0x75b   :  { %3720 = vrcp.f32 %v1233_v62 }
 0x765   :  { %v3721_v9 = vpop.eup %3720 }
 0x766   :  { %v1235_v18 = vmul.f32 %v3721_v9, %v3719_v1 }
 0x799   :  { %v1065_v12 = vpop.f32.mrb[6].mxu1 }
 0x79a   :  { %v3302_v15 = vpop.f32.mrb[7].mxu1  ;;  %3306 = vmatmul.mubr.msk.f32.vlgmr.msra.gmra.mrb[8].mxu1 %vm412_vm2, %v1065_v12  ;;  %v153_v12 = vld [vmem:[%s4526_s8 + $0x30] sm:$0xff] }
 0x79b   :  { %3545 = vmatpush3.bf16.msra.mxu1 %v3544_v10  ;;  %3319 = vmatprep.mubr.msk.f32.mxu1 %vm3884_vm1, %v3885_v21  ;;  %v154_v15 = vld [vmem:[%s4526_s8 + $0x38] sm:$0xff] }
 0x79c   :  { %3322 = vmatprep.subr.mxu1 %v3885_v21 }
 0x79e   :  { %3320 = vmatmul.mubr.msk.f32.vlgmr.msra.gmra.mrb[10].mxu1 %vm492_vm4, %v1235_v18  ;;  %v3063_v18 = vld [vmem:[%s4520_s2 + $0x10] sm:$0xff] }
 0x79f   :  { %3324 = vmatprep.mubr.msk.f32.mxu1 %vm3884_vm1, %v3885_v21  ;;  %3323 = vmatpush3.msra.mxu1 %v4231_v24 }
 0x7a0   :  { %3552 = vmatprep.subr.bf16.mxu1 %v3883_v17 }
 0x86d   :  { %v1138_v25 = vpop.f32.mrb[8].mxu1 }
 0x86e   :  { %v1142_v26 = vadd.f32 %v1138_v25, %v894_v41  ;;  %v3307_v27 = vpop.f32.mrb[9].mxu1  ;;  %v4320_v25 = vpack.c.bf16 %v154_v15, %v153_v12 }
 0x871   :  { %v1311_v29 = vpop.f32.mrb[10].mxu1 }
 0x872   :  { %v3321_v30 = vpop.f32.mrb[11].mxu1  ;;  %3325 = vmatmul.mubr.msk.f32.vlgmr.msra.gmra.mrb[12].mxu1 %vm412_vm2, %v1311_v29 }
 0x873   :  { %3354 = vmatprep.mubr.msk.f32.mxu1 %vm3884_vm1, %v3885_v21  ;;  %3554 = vmatpush3.bf16.msra.mxu1 %v4273_v57 }
 0x874   :  { %3555 = vmatprep.subr.bf16.mxu1 %v3883_v17 }
 0x877   :  { %3557 = vmatpush3.bf16.msra.mxu1 %v4279_v59 }
 0x878   :  { %3558 = vmatprep.subr.bf16.mxu1 %v3883_v17 }
 0x87b   :  { %3560 = vmatpush3.bf16.msra.mxu1 %v4289_v63 }
 0x87c   :  { %3561 = vmatprep.subr.bf16.mxu1 %v3883_v17 }
 0x87f   :  { %3563 = vmatpush3.bf16.msra.mxu1 %v4320_v25 }
 0x880   :  { %3580 = vmatprep.subr.bf16.mxu1 %v3883_v17 }
 0x945   :  { %v1384_v33 = vpop.f32.mrb[12].mxu1 }
 0x946   :  { %v1388_v35 = vadd.f32 %v1384_v33, %v1142_v26  ;;  %v3326_v36 = vpop.f32.mrb[13].mxu1 }
 0x948   :  { %v1395_v39 = vadd.f32 %v4244_v31, %v1388_v35 }
 0x94a   :  { %v1400_v41 = vmul.f32 %v4247_v38, %v1395_v39 }
 0x94c   :  { %v1401_v42 = vadd.f32 %v1400_v41, %v1397_v40  ;;  %v4369_v40 = vld [vmem:[%s4547_s25] ss:$0 sm:$0xff] }
 0x94e   :  { %v1402_v43 = vsel %vm170_vm0, %v1401_v42, 0.0 }
 0x94f   :  { %1403 = vadd.xlane.f32.xlu0 %v1402_v43 }
 0x9dc   :  { %v1404_v44 = vpop.xlane.xlu0 %1403 }
 0x9dd   :  { %v1406_v45 = vmul.f32 0.03125, %v1404_v44 }
 0x9df   :  { %v1407_v46 = vsub.f32 %v1401_v42, %v1406_v45 }
 0x9e1   :  { %v1408_v47 = vmul.f32 %v1407_v46, %v1407_v46 }
 0x9e3   :  { %v1409_v48 = vsel %vm170_vm0, %v1408_v47, 0.0 }
 0x9e4   :  { %1410 = vadd.xlane.f32.xlu1 %v1409_v48 }
 0xa71   :  { %v1411_v0 = vpop.xlane.xlu1 %1410 }
 0xa72   :  { %v1412_v1 = vmul.f32 0.03125, %v1411_v0 }
 0xa74   :  { %v1413_v2 = vadd.f32 1e-12, %v1412_v1 }
 0xa76   :  { %3722 = vrsqrt.f32 %v1413_v2 }
 0xa80   :  { %v3723_v62 = vpop.eup %3722 }
 0xa81   :  { %v1415_v7 = vmul.f32 %v3723_v62, %v1407_v46 }
 0xa83   :  { %v1422_v9 = vmul.f32 %v4297_v5, %v1415_v7 }
 0xa85   :  { %v1429_v10 = vadd.f32 %v4302_v8, %v1422_v9 }
 0xa87   :  { %3336 = vmatmul.mubr.msk.f32.vlgmr.msra.gmra.mrb[16].mxu0 %vm170_vm0, %v1429_v10 }
 0xa88   :  { %3567 = vmatpush3.bf16.msra.mxu0 %v4061_v3  ;;  %3365 = vmatprep.mubr.msk.f32.mxu0 %vm170_vm0, %v3063_v18  ;;  %v3064_v3 = vld [vmem:[%s4520_s2 + $0x18] sm:$0xff] }
 0xa89   :  { %3569 = vmatprep.subr.bf16.mxu0 %v4069_v6 }
 0xa8c   :  { %3571 = vmatpush3.bf16.msra.mxu0 %v4069_v6  ;;  %v4340_v6 = vld [vmem:[%s4531_s13] ss:$0 sm:$0xff]  ;;  %s4363_s13 = sld [smem:[#allocation2 + $0x1]] }
 0xa8d   :  { %3573 = vmatprep.subr.bf16.mxu0 %v4082_v13 }
 0xa8f   :  { %3366 = vmatmul.mubr.msk.f32.vlgmr.msra.gmra.mrb[18].mxu0 %vm170_vm0, %v3064_v3 }
 0xa90   :  { %3575 = vmatpush3.bf16.msra.mxu0 %v4082_v13  ;;  %3376 = vmatprep.mubr.msk.f32.mxu0 %vm170_vm0, %v3063_v18 }
 0xa91   :  { %3577 = vmatprep.subr.bf16.mxu0 %v4084_v14 }
 0xa92   :  { %s1592_s29 = ssub.f32 1.0, %s4363_s13  ;;  %v1590_v45 = vstv %s4363_s13 }
 0xa93   :  { %v1591_v50 = vmul.f32 %v1590_v45, %v1429_v10 }
 0xa94   :  { %3579 = vmatpush3.bf16.msra.mxu0 %v4084_v14  ;;  %v4349_v14 = vld [vmem:[#allocation6 + $0x8] sm:$0xff]  ;;  %v4373_v44 = vstv %s1592_s29 }
 0xa95   :  { %3586 = vmatprep.subr.bf16.mxu0 %v3883_v17 }
 0xa97   :  { %3377 = vmatmul.mubr.msk.f32.vlgmr.msra.gmra.mrb[20].mxu0 %vm170_vm0, %v3064_v3 }
 0xa98   :  { %3394 = vmatprep.mubr.msk.f32.mxu0 %vm3884_vm1, %v3885_v21 }
 0xb5a   :  { %v1505_v26 = vpop.f32.mrb[16].mxu0 }
 0xb5b   :  { %v1506_v13 = vadd.f32 %v4340_v6, %v1505_v26  ;;  %v3337_v27 = vpop.f32.mrb[17].mxu0 }
 0xb5d   :  { %v1509_v29 = vmax.f32 %v1506_v13, 0.0 }
 0xb5f   :  { %3355 = vmatmul.mubr.msk.f32.vlgmr.msra.gmra.mrb[14].mxu1 %vm1516_vm5, %v1509_v29 }
 0xb60   :  { %3582 = vmatpush3.bf16.msra.mxu1 %v4091_v16  ;;  %3387 = vmatprep.mubr.msk.f32.mxu1 %vm3884_vm1, %v3885_v21 }
 0xb61   :  { %3583 = vmatprep.subr.bf16.mxu1 %v3883_v17 }
 0xb62   :  { %v3367_v30 = vpop.f32.mrb[18].mxu0 }
 0xb63   :  { %v1695_v16 = vadd.f32 %v3367_v30, %v4125_v23  ;;  %v1689_v33 = vpop.f32.mrb[19].mxu0 }
 0xb64   :  { %3585 = vmatpush3.bf16.msra.mxu1 %v4104_v20  ;;  %v1690_v35 = vadd.f32 %v4125_v23, %v1689_v33 }
 0xb65   :  { %3590 = vmatprep.subr.bf16.mxu1 %v3883_v17 }
 0xb66   :  { %v3587_v36 = vpack.c.bf16 %v1695_v16, %v1690_v35  ;;  %v4358_v39 = vpack.i.bf16 %v1695_v16, %v1690_v35 }
 0xb67   :  { %3388 = vmatmul.mubr.msk.f32.vlgmr.msra.gmra.mrb[16].mxu1 %vm170_vm0, %v4349_v14 }
 0xb68   :  { %3401 = vmatprep.mubr.msk.f32.mxu1 %vm3884_vm1, %v3885_v21  ;;  %3589 = vmatpush3.bf16.xpose.msk.msra.mxu0 %vm4131_vm3, %v3587_v36 }
 0xb69   :  { %3597 = vmatprep.subr.bf16.mxu0 %v3883_v17 }
 0xb6a   :  { %v3378_v20 = vpop.f32.mrb[20].mxu0 }
 0xb6b   :  { %v1770_v23 = vadd.f32 %v3378_v20, %v4152_v37  ;;  %v1764_v41 = vpop.f32.mrb[21].mxu0 }
 0xb6c   :  { %v1765_v42 = vadd.f32 %v4152_v37, %v1764_v41 }
 0xb6e   :  { %v3591_v48 = vpack.c.bf16 %v1770_v23, %v1765_v42  ;;  %v4407_v30 = vpack.i.bf16 %v1770_v23, %v1765_v42 }
 0xb70   :  { %3592 = vmatpush3.bf16.msra.mxu1 %v3591_v48 }
 0xb71   :  { %3593 = vmatprep.subr.bf16.mxu1 %v3883_v17 }
 0xc32   :  { %v1586_v43 = vpop.f32.mrb[14].mxu1 }
 0xc33   :  { %v1587_v46 = vadd.f32 %v4369_v40, %v1586_v43  ;;  %v3356_v47 = vpop.f32.mrb[15].mxu1 }
 0xc35   :  { %v1594_v49 = vmul.f32 %v4373_v44, %v1587_v46 }
 0xc37   :  { %v4381_v22 = vadd.f32 %v1594_v49, %v1591_v50 }
 0xc3a   :  { %v1842_v52 = vpop.f32.mrb[16].mxu1 }
 0xc3b   :  { %v1843_v37 = vadd.f32 %v4141_v32, %v1842_v52  ;;  %v3389_v54 = vpop.f32.mrb[17].mxu1 }
 0xc3d   :  { %2009 = vrot.lane.b32.xlu0 %v1843_v37, %s3886_s18  ;;  %3395 = vmatmul.mubr.msk.f32.vlgmr.msra.gmra.mrb[22].mxu0 %vm412_vm2, %v1843_v37 }
 0xc3e   :  { %3415 = vmatprep.mubr.msk.f32.mxu0 %vm3884_vm1, %v3885_v21 }
 0xcaf   :  { %v2010_v18 = vpop.permute.xlu0 %2009 }
 0xd10   :  { %v1921_v55 = vpop.f32.mrb[22].mxu0 }
 0xd11   :  { %v3396_v56 = vpop.f32.mrb[23].mxu0  ;;  %v1925_v58 = vsel %vm492_vm4, %v1921_v55, -inf }
 0xd12   :  { %1926 = vmax.xlane.f32.xlu1 %v1925_v58 }
 0xd9f   :  { %v1927_v60 = vpop.xlane.xlu1 %1926 }
 0xda0   :  { %v1928_v61 = vsub.f32 %v1921_v55, %v1927_v60 }
 0xda2   :  { %v1929_v0 = vmul.f32 1.442695, %v1928_v61 }
 0xda4   :  { %3724 = vpow2.f32 %v1929_v0 }
 0xdae   :  { %v3725_v1 = vpop.eup %3724 }
 0xdaf   :  { %v1931_v32 = vsel %vm492_vm4, %v3725_v1, 0.0 }
 0xdb0   :  { %1932 = vadd.xlane.f32.xlu1 %v1931_v32 }
 0xdc1   :  { %3677 = vrot.lane.b32.xlu1 %v4358_v39, %s3886_s18 }
 0xe3d   :  { %v1933_v2 = vpop.xlane.xlu1 %1932 }
 0xe3e   :  { %3726 = vrcp.f32 %v1933_v2 }
 0xe41   :  { %v3678_v62 = vpop.permute.xlu1 %3677 }
 0xe42   :  { %v3680_v7 = vunpack.i.h.bf16 %v3678_v62  ;;  %v3679_v9 = vunpack.i.l.bf16 %v3678_v62 }
 0xe44   :  { %v3594_v15 = vpack.c.bf16 %v3680_v7, %v3679_v9 }
 0xe48   :  { %v3727_v10 = vpop.eup %3726 }
 0xe49   :  { %v1935_v12 = vmul.f32 %v3727_v10, %v3725_v1 }
 0xe4b   :  { %3402 = vmatmul.mubr.msk.f32.vlgmr.msra.gmra.mrb[18].mxu1 %vm492_vm4, %v1935_v12 }
 0xe4c   :  { %3596 = vmatpush3.bf16.xpose.msk.msra.mxu1 %vm4131_vm3, %v3594_v15  ;;  %3408 = vmatprep.mubr.msk.f32.mxu1 %vm3884_vm1, %v3885_v21 }
 0xe4d   :  { %3423 = vmatprep.subr.mxu1 %v3885_v21 }
 0xe53   :  { %3409 = vmatmul.mubr.msk.f32.vlgmr.msra.gmra.mrb[20].mxu1 %vm412_vm2, %v2010_v18 }
 0xe54   :  { %3424 = vmatpush3.msra.mxu1 %v4186_v19  ;;  %3425 = vmatprep.mubr.msk.f32.mxu1 %vm3884_vm1, %v3885_v21 }
 0xe55   :  { %3604 = vmatprep.subr.bf16.mxu1 %v3883_v17 }
 0xf1e   :  { %v2005_v3 = vpop.f32.mrb[18].mxu1 }
 0xf1f   :  { %v3403_v26 = vpop.f32.mrb[19].mxu1  ;;  %3426 = vmatmul.mubr.msk.f32.vlgmr.msra.gmra.mrb[22].mxu1 %vm412_vm2, %v2005_v3 }
 0xf20   :  { %3439 = vmatprep.mubr.msk.f32.mxu1 %vm3884_vm1, %v3885_v21 }
 0xf26   :  { %v2087_v13 = vpop.f32.mrb[20].mxu1 }
 0xf27   :  { %v3410_v27 = vpop.f32.mrb[21].mxu1  ;;  %v2091_v29 = vsel %vm492_vm4, %v2087_v13, -inf }
 0xf28   :  { %2092 = vmax.xlane.f32.xlu1 %v2091_v29 }
 0xf39   :  { %3682 = vrot.lane.b32.xlu1 %v4407_v30, %s3886_s18  ;;  %s3889_s18 = smov [#allocation12]  }
 0xf3d   :  { %2329 = vrot.lane.b32.xlu1 %v1843_v37, %s3888_s11 }
 0xf41   :  { %3692 = vrot.lane.b32.xlu1 %v4358_v39, %s3887_s9 }
 0xf45   :  { %2575 = vrot.lane.b32.xlu1 %v1843_v37, %s3887_s9 }
 0xfb5   :  { %v2093_v19 = vpop.xlane.xlu1 %2092 }
 0xfb6   :  { %v2094_v16 = vsub.f32 %v2087_v13, %v2093_v19 }
 0xfb8   :  { %v2095_v33 = vmul.f32 1.442695, %v2094_v16 }
 0xfb9   :  { %v3683_v35 = vpop.permute.xlu1 %3682 }
 0xfba   :  { %3728 = vpow2.f32 %v2095_v33  ;;  %v3685_v36 = vunpack.i.h.bf16 %v3683_v35  ;;  %v3684_v20 = vunpack.i.l.bf16 %v3683_v35 }
 0xfbc   :  { %v3598_v41 = vpack.c.bf16 %v3685_v36, %v3684_v20 }
 0xfbd   :  { %v2330_v52 = vpop.permute.xlu1 %2329 }
 0xfbe   :  { %3599 = vmatpush3.bf16.msra.mxu0 %v3598_v41 }
 0xfbf   :  { %3418 = vmatprep.subr.mxu0 %v3885_v21 }
 0xfc1   :  { %v3693_v56 = vpop.permute.xlu1 %3692 }
 0xfc2   :  { %v3694_v60 = vunpack.i.l.bf16 %v3693_v56 }
 0xfc4   :  { %v3729_v23 = vpop.eup %3728 }
 0xfc5   :  { %v2097_v42 = vsel %vm492_vm4, %v3729_v23, 0.0  ;;  %v2576_v0 = vpop.permute.xlu1 %2575 }
 0xfc6   :  { %2098 = vadd.xlane.f32.xlu0 %v2097_v42 }
 0xfdc   :  { %3687 = vrot.lane.b32.xlu0 %v4358_v39, %s3888_s11 }
 0xff2   :  { %v2325_v43 = vpop.f32.mrb[22].mxu1 }
 0xff3   :  { %v3427_v46 = vpop.f32.mrb[23].mxu1 }
0x1053   :  { %v2099_v47 = vpop.xlane.xlu0 %2098 }
0x1054   :  { %3730 = vrcp.f32 %v2099_v47 }
0x1057   :  { %v3688_v50 = vpop.permute.xlu0 %3687 }
0x1058   :  { %v3690_v37 = vunpack.i.h.bf16 %v3688_v50  ;;  %v3689_v54 = vunpack.i.l.bf16 %v3688_v50 }
0x105a   :  { %v3601_v39 = vpack.c.bf16 %v3690_v37, %v3689_v54 }
0x105e   :  { %v3731_v48 = vpop.eup %3730 }
0x105f   :  { %v2101_v49 = vmul.f32 %v3731_v48, %v3729_v23 }
0x1061   :  { %3416 = vmatmul.mubr.msk.f32.vlgmr.msra.gmra.mrb[24].mxu0 %vm492_vm4, %v2101_v49 }
0x1062   :  { %3419 = vmatpush3.msra.mxu0 %v4179_v11  ;;  %3420 = vmatprep.mubr.msk.f32.mxu0 %vm3884_vm1, %v3885_v21  ;;  %v3695_v11 = vunpack.i.h.bf16 %v3693_v56 }
0x1063   :  { %3600 = vmatprep.subr.bf16.mxu0 %v3883_v17 }
0x1064   :  { %v3608_v61 = vpack.c.bf16 %v3695_v11, %v3694_v60 }
0x1134   :  { %v2179_v55 = vpop.f32.mrb[24].mxu0 }
0x1135   :  { %v3417_v58 = vpop.f32.mrb[25].mxu0  ;;  %3421 = vmatmul.mubr.msk.f32.vlgmr.msra.gmra.mrb[26].mxu0 %vm412_vm2, %v2179_v55 }
0x1136   :  { %3603 = vmatpush3.bf16.xpose.msk.msra.mxu0 %vm4131_vm3, %v3601_v39  ;;  %3432 = vmatprep.mubr.msk.f32.mxu0 %vm3884_vm1, %v3885_v21 }
0x1137   :  { %3607 = vmatprep.subr.bf16.mxu0 %v3883_v17 }
0x113d   :  { %3433 = vmatmul.mubr.msk.f32.vlgmr.msra.gmra.mrb[28].mxu0 %vm412_vm2, %v2330_v52 }
0x113e   :  { %3610 = vmatpush3.bf16.xpose.msk.msra.mxu0 %vm4131_vm3, %v3608_v61  ;;  %3451 = vmatprep.mubr.msk.f32.mxu0 %vm3884_vm1, %v3885_v21 }
0x113f   :  { %3614 = vmatprep.subr.bf16.mxu0 %v3883_v17 }
0x1145   :  { %3452 = vmatmul.mubr.msk.f32.vlgmr.msra.gmra.mrb[30].mxu0 %vm412_vm2, %v2576_v0 }
0x1146   :  { %3616 = vmatpush3.bf16.msra.mxu0 %v4256_v51  ;;  %3474 = vmatprep.mubr.msk.f32.mxu0 %vm3884_vm1, %v3885_v21 }
0x1147   :  { %3617 = vmatprep.subr.bf16.mxu0 %v3883_v17 }
0x114a   :  { %3619 = vmatpush3.bf16.msra.mxu0 %v4260_v53 }
0x1208   :  { %v2252_v1 = vpop.f32.mrb[26].mxu0 }
0x1209   :  { %v2326_v28 = vadd.f32 %v2325_v43, %v2252_v1  ;;  %v3422_v32 = vpop.f32.mrb[27].mxu0 }
0x1210   :  { %v2407_v2 = vpop.f32.mrb[28].mxu0 }
0x1211   :  { %v3434_v62 = vpop.f32.mrb[29].mxu0  ;;  %v2411_v7 = vsel %vm492_vm4, %v2407_v2, -inf }
0x1212   :  { %2412 = vmax.xlane.f32.xlu0 %v2411_v7 }
0x1218   :  { %v2653_v9 = vpop.f32.mrb[30].mxu0 }
0x1219   :  { %v3453_v10 = vpop.f32.mrb[31].mxu0  ;;  %v2657_v29 = vsel %vm492_vm4, %v2653_v9, -inf }
0x1228   :  { %3697 = vrot.lane.b32.xlu0 %v4407_v30, %s3888_s11 }
0x129f   :  { %v2413_v51 = vpop.xlane.xlu0 %2412 }
0x12a0   :  { %v2414_v12 = vsub.f32 %v2407_v2, %v2413_v51 }
0x12a2   :  { %v2415_v15 = vmul.f32 1.442695, %v2414_v12 }
0x12a3   :  { %v3698_v18 = vpop.permute.xlu0 %3697 }
0x12a4   :  { %3732 = vpow2.f32 %v2415_v15  ;;  %v3700_v3 = vunpack.i.h.bf16 %v3698_v18  ;;  %v3699_v53 = vunpack.i.l.bf16 %v3698_v18 }
0x12a6   :  { %v3605_v26 = vpack.c.bf16 %v3700_v3, %v3699_v53 }
0x12a8   :  { %3606 = vmatpush3.bf16.msra.mxu1 %v3605_v26 }
0x12a9   :  { %3442 = vmatprep.subr.mxu1 %v3885_v21 }
0x12ae   :  { %v3733_v13 = vpop.eup %3732 }
0x12af   :  { %v2417_v27 = vsel %vm492_vm4, %v3733_v13, 0.0 }
0x12b0   :  { %2418 = vadd.xlane.f32.xlu1 %v2417_v27 }
0x12b4   :  { %2658 = vmax.xlane.f32.xlu1 %v2657_v29 }
0x133d   :  { %v2419_v19 = vpop.xlane.xlu1 %2418 }
0x133e   :  { %3734 = vrcp.f32 %v2419_v19 }
0x1341   :  { %v2659_v16 = vpop.xlane.xlu1 %2658 }
0x1342   :  { %v2660_v33 = vsub.f32 %v2653_v9, %v2659_v16 }
0x1344   :  { %v2661_v35 = vmul.f32 1.442695, %v2660_v33 }
0x1346   :  { %3736 = vpow2.f32 %v2661_v35 }
0x1348   :  { %v3735_v36 = vpop.eup %3734 }
0x1349   :  { %v2421_v20 = vmul.f32 %v3735_v36, %v3733_v13 }
0x134b   :  { %3440 = vmatmul.mubr.msk.f32.vlgmr.msra.gmra.mrb[24].mxu1 %vm492_vm4, %v2421_v20 }
0x134c   :  { %3443 = vmatpush3.msra.mxu1 %v4220_v4  ;;  %3444 = vmatprep.mubr.msk.f32.mxu1 %vm3884_vm1, %v3885_v21 }
0x134d   :  { %3611 = vmatprep.subr.bf16.mxu1 %v3883_v17 }
0x1350   :  { %v3737_v41 = vpop.eup %3736 }
0x1351   :  { %v2663_v23 = vsel %vm492_vm4, %v3737_v41, 0.0 }
0x1352   :  { %2664 = vadd.xlane.f32.xlu1 %v2663_v23 }
0x1363   :  { %3702 = vrot.lane.b32.xlu1 %v4407_v30, %s3887_s9  ;;  %s3012_s9 = sshll.u32 %s3889_s18, 4  ;;  %s3013_s9 = int_to_ptr.vmem [resolvable:$true] %s3012_s9 }
0x1364   :  { %s3844_s11 = scalar_lea.vmem %s3013_s9, 256  ;;  %p3849_p8 = scmp.lt.s32.totalorder %s3013_s9, %s3013_s9 }
0x1365   :  { %p3845_p7 = scmp.ne.s32.totalorder %s3013_s9, %s3844_s11  ;;  %p3850_p9 = scmp.lt.s32.totalorder %s3844_s11, %s3844_s11 }
0x1367   :  { %p3851_p10 = por %p3850_p9, %p3849_p8 }
0x1369   :  { %p3852_p11 = pnand %p3851_p10, %p3845_p7 }
0x13df   :  { %v2665_v42 = vpop.xlane.xlu1 %2664 }
0x13e0   :  { %3738 = vrcp.f32 %v2665_v42 }
0x13e3   :  { %v3703_v43 = vpop.permute.xlu1 %3702 }
0x13e4   :  { %v3705_v46 = vunpack.i.h.bf16 %v3703_v43  ;;  %v3704_v47 = vunpack.i.l.bf16 %v3703_v43 }
0x13e6   :  { %v3612_v49 = vpack.c.bf16 %v3705_v46, %v3704_v47 }
0x13ea   :  { %v3739_v48 = vpop.eup %3738 }
0x13eb   :  { %v2667_v52 = vmul.f32 %v3739_v48, %v3737_v41 }
0x141e   :  { %v2497_v4 = vpop.f32.mrb[24].mxu1 }
0x141f   :  { %v3441_v50 = vpop.f32.mrb[25].mxu1  ;;  %3445 = vmatmul.mubr.msk.f32.vlgmr.msra.gmra.mrb[26].mxu1 %vm412_vm2, %v2497_v4 }
0x1420   :  { %3613 = vmatpush3.bf16.msra.mxu1 %v3612_v49  ;;  %3458 = vmatprep.mubr.msk.f32.mxu1 %vm3884_vm1, %v3885_v21 }
0x1421   :  { %3461 = vmatprep.subr.mxu1 %v3885_v21 }
0x1423   :  { %3459 = vmatmul.mubr.msk.f32.vlgmr.msra.gmra.mrb[28].mxu1 %vm492_vm4, %v2667_v52 }
0x1424   :  { %3462 = vmatpush3.msra.mxu1 %v4231_v24  ;;  %3463 = vmatprep.mubr.msk.f32.mxu1 %vm3884_vm1, %v3885_v21 }
0x1425   :  { %3620 = vmatprep.subr.bf16.mxu1 %v3883_v17 }
0x14f2   :  { %v2570_v30 = vpop.f32.mrb[26].mxu1 }
0x14f3   :  { %v2574_v37 = vadd.f32 %v2570_v30, %v2326_v28  ;;  %v3446_v54 = vpop.f32.mrb[27].mxu1 }
0x14f6   :  { %v2743_v39 = vpop.f32.mrb[28].mxu1 }
0x14f7   :  { %v3460_v55 = vpop.f32.mrb[29].mxu1  ;;  %3464 = vmatmul.mubr.msk.f32.vlgmr.msra.gmra.mrb[30].mxu1 %vm412_vm2, %v2743_v39 }
0x14f8   :  { %3622 = vmatpush3.bf16.msra.mxu1 %v4273_v57  ;;  %3493 = vmatprep.mubr.msk.f32.mxu1 %vm3884_vm1, %v3885_v21  ;;  %v2822_v21 = vmul.f32 %v4349_v14, %v1396_v34 }
0x14f9   :  { %3623 = vmatprep.subr.bf16.mxu1 %v3883_v17 }
0x14fc   :  { %3625 = vmatpush3.bf16.msra.mxu1 %v4279_v59 }
0x14fd   :  { %3626 = vmatprep.subr.bf16.mxu1 %v3883_v17 }
0x1500   :  { %3628 = vmatpush3.bf16.msra.mxu1 %v4289_v63  ;;  %v1596_v63 = vsel %vm170_vm0, %v4381_v22, 0.0 }
0x1501   :  { %3629 = vmatprep.subr.bf16.mxu1 %v3883_v17 }
0x1504   :  { %3631 = vmatpush3.bf16.msra.mxu1 %v4320_v25 }
0x15ca   :  { %v2816_v24 = vpop.f32.mrb[30].mxu1 }
0x15cb   :  { %v2820_v56 = vadd.f32 %v2816_v24, %v2574_v37  ;;  %v3465_v58 = vpop.f32.mrb[31].mxu1 }
0x15cd   :  { %v2821_v57 = vadd.f32 %v4244_v31, %v2820_v56 }
0x15cf   :  { %v2823_v11 = vmul.f32 %v2821_v57, %v4247_v38 }
0x15d1   :  { %v2824_v60 = vadd.f32 %v2823_v11, %v2822_v21 }
0x15d3   :  { %v2825_v59 = vsel %vm170_vm0, %v2824_v60, 0.0 }
0x15d4   :  { %2826 = vadd.xlane.f32.xlu0 %v2825_v59 }
0x15d8   :  { %1597 = vadd.xlane.f32.xlu0 %v1596_v63 }
0x1661   :  { %v2827_v17 = vpop.xlane.xlu0 %2826 }
0x1662   :  { %v2828_v25 = vmul.f32 0.03125, %v2827_v17 }
0x1664   :  { %v2829_v61 = vsub.f32 %v2824_v60, %v2828_v25 }
0x1665   :  { %v1598_v51 = vpop.xlane.xlu0 %1597 }
0x1666   :  { %v2830_v0 = vmul.f32 %v2829_v61, %v2829_v61  ;;  %v1599_v12 = vmul.f32 0.03125, %v1598_v51 }
0x1668   :  { %v2831_v1 = vsel %vm170_vm0, %v2830_v0, 0.0  ;;  %v1600_v53 = vsub.f32 %v4381_v22, %v1599_v12 }
0x1669   :  { %2832 = vadd.xlane.f32.xlu1 %v2831_v1 }
0x16f6   :  { %v2833_v31 = vpop.xlane.xlu1 %2832 }
0x16f7   :  { %v2834_v28 = vmul.f32 0.03125, %v2833_v31 }
0x16f9   :  { %v2835_v34 = vadd.f32 1e-12, %v2834_v28 }
0x16fb   :  { %3740 = vrsqrt.f32 %v2835_v34 }
0x1705   :  { %v3741_v38 = vpop.eup %3740 }
0x1706   :  { %v2837_v14 = vmul.f32 %v3741_v38, %v2829_v61 }
0x1708   :  { %v2838_v32 = vmul.f32 %v4297_v5, %v2837_v14 }
0x170a   :  { %v2839_v2 = vadd.f32 %v4302_v8, %v2838_v32 }
0x170c   :  { %3475 = vmatmul.mubr.msk.f32.vlgmr.msra.gmra.mrb[32].mxu0 %vm170_vm0, %v2839_v2  ;;  %v2987_v13 = vmul.f32 %v2839_v2, %v1590_v45 }
0x17df   :  { %v2909_v62 = vpop.f32.mrb[32].mxu0 }
0x17e0   :  { %v2910_v7 = vadd.f32 %v4340_v6, %v2909_v62  ;;  %v3476_v9 = vpop.f32.mrb[33].mxu0  ;;  %v1601_v6 = vmul.f32 %v1600_v53, %v1600_v53 }
0x17e2   :  { %v2913_v10 = vmax.f32 %v2910_v7, 0.0  ;;  %v1602_v19 = vsel %vm170_vm0, %v1601_v6, 0.0 }
0x17e4   :  { %3494 = vmatmul.mubr.msk.f32.vlgmr.msra.gmra.mrb[32].mxu1 %vm1516_vm5, %v2913_v10 }
0x18b7   :  { %v2983_v15 = vpop.f32.mrb[32].mxu1 }
0x18b8   :  { %v2984_v18 = vadd.f32 %v4369_v40, %v2983_v15  ;;  %v3495_v3 = vpop.f32.mrb[33].mxu1 }
0x18ba   :  { %v2988_v26 = vmul.f32 %v2984_v18, %v4373_v44 }
0x18bc   :  { %v2989_v27 = vadd.f32 %v2988_v26, %v2987_v13 }
0x18be   :  { %v2990_v29 = vsel %vm170_vm0, %v2989_v27, 0.0 }
0x18bf   :  { %2991 = vadd.xlane.f32.xlu0 %v2990_v29 }
0x18c3   :  { %1603 = vadd.xlane.f32.xlu0 %v1602_v19 }
0x194c   :  { %v2992_v16 = vpop.xlane.xlu0 %2991 }
0x194d   :  { %v2993_v33 = vmul.f32 0.03125, %v2992_v16 }
0x194f   :  { %v2994_v35 = vsub.f32 %v2989_v27, %v2993_v33 }
0x1950   :  { %v1604_v36 = vpop.xlane.xlu0 %1603 }
0x1951   :  { %v1605_v40 = vmul.f32 0.03125, %v1604_v36  ;;  %v2995_v20 = vmul.f32 %v2994_v35, %v2994_v35 }
0x1953   :  { %v1606_v41 = vadd.f32 1e-12, %v1605_v40  ;;  %v2996_v22 = vsel %vm170_vm0, %v2995_v20, 0.0 }
0x1954   :  { %2997 = vadd.xlane.f32.xlu0 %v2996_v22 }
0x1955   :  { %3742 = vrsqrt.f32 %v1606_v41 }
0x195f   :  { %v3743_v44 = vpop.eup %3742 }
0x1960   :  { %v1608_v45 = vmul.f32 %v3743_v44, %v1600_v53 }
0x1962   :  { %v1609_v23 = vmul.f32 %v4297_v5, %v1608_v45 }
0x1964   :  { %v1610_v42 = vadd.f32 %v4302_v8, %v1609_v23 }
0x1966   :  { %1611 = vst.msk [vmem:[#allocation12] sm:$0xff] %vm170_vm0, %v1610_v42 }
0x19e1   :  { %v2998_v43 = vpop.xlane.xlu0 %2997 }
0x19e2   :  { %v2999_v46 = vmul.f32 0.03125, %v2998_v43 }
0x19e4   :  { %v3000_v47 = vadd.f32 1e-12, %v2999_v46 }
0x19e6   :  { %3744 = vrsqrt.f32 %v3000_v47 }
0x19f0   :  { %v3745_v48 = vpop.eup %3744 }
0x19f1   :  { %v3002_v49 = vmul.f32 %v3745_v48, %v2994_v35 }
0x19f3   :  { %v3003_v4 = vmul.f32 %v4297_v5, %v3002_v49 }
0x19f5   :  { %v3004_v50 = vadd.f32 %v4302_v8, %v3003_v4 }
0x19f7   :  { %3006 = vst.msk [vmem:[#allocation12 + $0x8] sm:$0xff] %vm170_vm0, %v3004_v50 }
0x19f8   :  { %3855 = shalt.err (!%p3852_p11)
}
0x19f9   :  { %s4548_s26 = sld [smem:[#allocation21_spill]] }
0x19ff   :  { %s3856_s6 = scalar_lea.hbm %s4548_s26, 256 }
0x1a00   :  { %p3857_p12 = scmp.ne.s32.totalorder %s4548_s26, %s3856_s6  ;;  %p3860_p13 = scmp.lt.u32.totalorder %s3856_s6, %s4548_s26 }
0x1a02   :  { %p3862_p0 = pnand %p3860_p13, %p3857_p12 }
0x1a04   :  { %3865 = shalt.err (!%p3862_p0)
}
0x1a05   :  { %3018 = dma.vmem_to_hbm [thread:$0]  %s3013_s9, 256, %s4548_s26, [#allocation4], %s3878_s21, %s3878_s21, %s3879_s22  }
0x1a06   :  { %3874 = dma.done.wait [#allocation4], 256  }
0x1a07   :  { %3875 = vsyncadd [#allocation4], 4294967040 }
0x1a08   :  { %3022 = vsyncpa [#allocation3], 1 }
0x1a09   :  { %3023 = vsyncpa [#allocation8], 1 }
0x1a0a   :  { %3024 = vsyncpa [#allocation11], 1 }
0x1a0b   :  { %3025 = vsyncpa [#allocation4], 1 }
0x1a0c   :  { %3026 = vsyncpa [#allocation5], 1 }

</bundles_post_ra>
